<compile_context>
chip_gen: v7x
topology: tpu7x:2x2x1
jax: 0.10.0
libtpu: 0.0.40
codegen_flags: <defaults>
</compile_context>

<pallas_src>
import jax
import jax.numpy as jnp
from jax.experimental import pallas as pl
from jax.experimental.pallas import tpu as pltpu


_CONV_BATCH_TILE = 32    # images per conv grid step (tile <= ~10 MiB dbl-buffered)
_MLP_BATCH_TILE = 256    # rows per MLP grid step


# --------------------------------------------------------------------------
# Kernels
# --------------------------------------------------------------------------
def _conv_relu_pool_kernel(p_ref, w_ref, b_ref, o_ref):
    """Fused conv-as-GEMM + 2x2 max-pool + bias + ReLU for a batch tile.

    p_ref: (P, F, Nb*R_pad) bf16  pooling-phase im2col patches
                                   (P = 4 pool phases, F = C_in*KH*KW,
                                    lane axis = batch-major merged pixels)
    w_ref: (O, F)            bf16  conv weight
    b_ref: (O, 1)            f32   conv bias
    o_ref: (O, Nb*R_pad)     f32   pooled output (lane-dense, 128-multiple)
    """
    w = w_ref[...]
    # Phase 0 initializes the running max; phases 1..3 fold in via maximum.
    acc = jnp.dot(w, p_ref[0], preferred_element_type=jnp.float32)
    for ph in range(1, p_ref.shape[0]):
        acc = jnp.maximum(
            acc, jnp.dot(w, p_ref[ph], preferred_element_type=jnp.float32))
    # Bias is phase-invariant -> add once after the phase max; ReLU commutes
    # with the max, so one ReLU at the end.
    o_ref[...] = jnp.maximum(acc + b_ref[...], 0.0).astype(o_ref.dtype)


def _mlp_kernel(x_ref, w1_ref, b1_ref, w2_ref, b2_ref, w3_ref, b3_ref, o_ref):
    """fc1+ReLU -> fc2+ReLU -> fc3 for one batch tile (3 MXU dots, bf16 in,
    f32 accumulation)."""
    h = jnp.dot(x_ref[...], w1_ref[...], preferred_element_type=jnp.float32)
    h = jnp.maximum(h + b1_ref[...], 0.0)
    h = jnp.dot(h.astype(w2_ref.dtype), w2_ref[...],
                preferred_element_type=jnp.float32)
    h = jnp.maximum(h + b2_ref[...], 0.0)
    h = jnp.dot(h.astype(w3_ref.dtype), w3_ref[...],
                preferred_element_type=jnp.float32)
    o_ref[...] = (h + b3_ref[...]).astype(o_ref.dtype)


# --------------------------------------------------------------------------
# Wrapper-side layout plumbing (pure XLA, tiny tensors)
# --------------------------------------------------------------------------
def _im2col_pool_phases(x_nchw, ksize, pool):
    """(N,C,H,W) -> (P=pool*pool, F=C*k*k, N, R=Hp*Wp) pooled-phase patches.

    patches[a*pool+b, c*k*k + dh*k + dw, n, i*Wp + j]
        = x[n, c, pool*i + a + dh, pool*j + b + dw]
    """
    N, C, H, W = x_nchw.shape
    Ho, Wo = H - ksize + 1, W - ksize + 1
    Hp, Wp = Ho // pool, Wo // pool
    taps = []
    for dh in range(ksize):
        for dw in range(ksize):
            taps.append(x_nchw[:, :, dh:dh + Ho, dw:dw + Wo])
    t = jnp.stack(taps, axis=2).reshape(N, C * ksize * ksize, Ho, Wo)
    phases = []
    for a in range(pool):
        for b in range(pool):
            phases.append(
                t[:, :, a::pool, b::pool].reshape(N, C * ksize * ksize, Hp * Wp))
    p = jnp.stack(phases, axis=0)                      # (P, N, F, R)
    return jnp.transpose(p, (0, 2, 1, 3)), Hp, Wp      # (P, F, N, R)


def _conv_relu_pool(x_nchw, w_mat, b_col, *, pool=2):
    """Conv2d(k, stride=1, valid) + ReLU + MaxPool2d(pool) via one Pallas call.

    x_nchw: (N, C, H, W) f32, w_mat: (O, C*k*k) bf16, b_col: (O, 1) f32.
    Returns (N, O, Hp, Wp) f32.
    """
    N, C, H, W = x_nchw.shape
    O, F = w_mat.shape
    ksize = int(round((F // C) ** 0.5))
    assert C * ksize * ksize == F

    # bf16 patch slab: halves the dominant HBM->VMEM DMA bytes.
    patches, Hp, Wp = _im2col_pool_phases(x_nchw.astype(jnp.bfloat16),
                                          ksize, pool)            # (P,F,N,R)
    P = patches.shape[0]
    R = Hp * Wp
    R_pad = pl.cdiv(R, 128) * 128          # lane-dense, 128-multiple per image

    Nb = min(_CONV_BATCH_TILE, N)          # images per grid step
    N_pad = pl.cdiv(N, Nb) * Nb
    patches = jnp.pad(patches,
                      ((0, 0), (0, 0), (0, N_pad - N), (0, R_pad - R)))
    patches = patches.reshape(P, F, N_pad * R_pad)     # batch merged into lanes
    L = Nb * R_pad                                     # lane width per step

    out = pl.pallas_call(
        _conv_relu_pool_kernel,
        out_shape=jax.ShapeDtypeStruct((O, N_pad * R_pad), jnp.float32),
        grid=(N_pad // Nb,),
        in_specs=[
            pl.BlockSpec((P, F, L), lambda t: (0, 0, t)),
            pl.BlockSpec((O, F), lambda t: (0, 0)),      # resident weight
            pl.BlockSpec((O, 1), lambda t: (0, 0)),      # resident bias
        ],
        out_specs=pl.BlockSpec((O, L), lambda t: (0, t)),
        compiler_params=pltpu.CompilerParams(
            dimension_semantics=("parallel",)),
    )(patches, w_mat, b_col)

    out = out.reshape(O, N_pad, R_pad)[:, :N, :R]       # drop batch/lane pad
    return jnp.transpose(out, (1, 0, 2)).reshape(N, O, Hp, Wp)


def _mlp(flat, w1, b1, w2, b2, w3, b3):
    """(N, 400) -> (N, 10): batch-tiled grid, weights resident in VMEM."""
    N, D = flat.shape
    n_out = w3.shape[1]
    Nb = min(_MLP_BATCH_TILE, N)
    N_pad = pl.cdiv(N, Nb) * Nb
    x = jnp.pad(flat.astype(jnp.bfloat16), ((0, N_pad - N), (0, 0)))

    out = pl.pallas_call(
        _mlp_kernel,
        out_shape=jax.ShapeDtypeStruct((N_pad, n_out), jnp.float32),
        grid=(N_pad // Nb,),
        in_specs=[
            pl.BlockSpec((Nb, D), lambda t: (t, 0)),
            pl.BlockSpec(w1.shape, lambda t: (0, 0)),
            pl.BlockSpec(b1.shape, lambda t: (0, 0)),
            pl.BlockSpec(w2.shape, lambda t: (0, 0)),
            pl.BlockSpec(b2.shape, lambda t: (0, 0)),
            pl.BlockSpec(w3.shape, lambda t: (0, 0)),
            pl.BlockSpec(b3.shape, lambda t: (0, 0)),
        ],
        out_specs=pl.BlockSpec((Nb, n_out), lambda t: (t, 0)),
        compiler_params=pltpu.CompilerParams(
            dimension_semantics=("parallel",)),
    )(x, w1, b1, w2, b2, w3, b3)
    return out[:N]


def prepare_params(p):
    """One-time (outside jit) weight layout prep: reshape conv weights to
    (O, C*k*k), transpose fc weights, cast GEMM operands to bf16, biases f32."""
    f32, bf16 = jnp.float32, jnp.bfloat16
    return {
        "conv1_w": jnp.asarray(p["conv1_w"], f32)
                      .reshape(p["conv1_w"].shape[0], -1).astype(bf16),
        "conv1_b": jnp.asarray(p["conv1_b"], f32).reshape(-1, 1),
        "conv2_w": jnp.asarray(p["conv2_w"], f32)
                      .reshape(p["conv2_w"].shape[0], -1).astype(bf16),
        "conv2_b": jnp.asarray(p["conv2_b"], f32).reshape(-1, 1),
        "fc1_w": jnp.asarray(p["fc1_w"], f32).T.astype(bf16),
        "fc1_b": jnp.asarray(p["fc1_b"], f32).reshape(1, -1),
        "fc2_w": jnp.asarray(p["fc2_w"], f32).T.astype(bf16),
        "fc2_b": jnp.asarray(p["fc2_b"], f32).reshape(1, -1),
        "fc3_w": jnp.asarray(p["fc3_w"], f32).T.astype(bf16),
        "fc3_b": jnp.asarray(p["fc3_b"], f32).reshape(1, -1),
    }


@jax.jit
def the_model_forward(x, params):
    """Forward pass of TheModelClass.  x: (N, 3, 32, 32) -> (N, 10)."""
    y = _conv_relu_pool(x, params["conv1_w"], params["conv1_b"])   # (N, 6, 14, 14)
    y = _conv_relu_pool(y, params["conv2_w"], params["conv2_b"])   # (N, 16, 5, 5)
    flat = y.reshape(y.shape[0], -1)                               # (N, 400) == torch .view
    return _mlp(flat,
                params["fc1_w"], params["fc1_b"],
                params["fc2_w"], params["fc2_b"],
                params["fc3_w"], params["fc3_b"])


# --------------------------------------------------------------------------
# Pure-JAX reference (same semantics as the PyTorch module, f32 throughout)
# --------------------------------------------------------------------------
def _maxpool2(y):
    N, C, H, W = y.shape
    return y.reshape(N, C, H // 2, 2, W // 2, 2).max(axis=(3, 5))


def _reference(x, p):
    def conv(inp, w):
        dn = jax.lax.conv_dimension_numbers(inp.shape, w.shape,
                                            ("NCHW", "OIHW", "NCHW"))
        return jax.lax.conv_general_dilated(inp, w, (1, 1), "VALID",
                                            dimension_numbers=dn)

    y = jnp.maximum(conv(x, p["conv1_w"]) + p["conv1_b"][None, :, None, None], 0.0)
    y = _maxpool2(y)
    z = jnp.maximum(conv(y, p["conv2_w"]) + p["conv2_b"][None, :, None, None], 0.0)
    z = _maxpool2(z)
    f = z.reshape(z.shape[0], -1)
    f = jnp.maximum(f @ p["fc1_w"].T + p["fc1_b"], 0.0)
    f = jnp.maximum(f @ p["fc2_w"].T + p["fc2_b"], 0.0)
    return f @ p["fc3_w"].T + p["fc3_b"]


# --------------------------------------------------------------------------
if __name__ == "__main__":
    # Input implied by the module: 3x32x32 (32 -> 28 -> 14 -> 10 -> 5; 16*5*5=400)
    key = jax.random.PRNGKey(0)
    ks = jax.random.split(key, 11)
    N = 2
    x = jax.random.normal(ks[0], (N, 3, 32, 32), jnp.float32)
    raw_params = {
        "conv1_w": 0.1 * jax.random.normal(ks[1], (6, 3, 5, 5), jnp.float32),
        "conv1_b": 0.1 * jax.random.normal(ks[2], (6,), jnp.float32),
        "conv2_w": 0.1 * jax.random.normal(ks[3], (16, 6, 5, 5), jnp.float32),
        "conv2_b": 0.1 * jax.random.normal(ks[4], (16,), jnp.float32),
        "fc1_w": 0.1 * jax.random.normal(ks[5], (120, 400), jnp.float32),
        "fc1_b": 0.1 * jax.random.normal(ks[6], (120,), jnp.float32),
        "fc2_w": 0.1 * jax.random.normal(ks[7], (84, 120), jnp.float32),
        "fc2_b": 0.1 * jax.random.normal(ks[8], (84,), jnp.float32),
        "fc3_w": 0.1 * jax.random.normal(ks[9], (10, 84), jnp.float32),
        "fc3_b": 0.1 * jax.random.normal(ks[10], (10,), jnp.float32),
    }
    params = prepare_params(raw_params)        # layout prep OUTSIDE jit

    out = the_model_forward(x, params)
    out = jax.block_until_ready(out)
    assert out.shape == (N, 10), out.shape

    ref = _reference(x, raw_params)
    # bf16 MXU inputs (f32 accumulation) -> relaxed tolerance vs f32 reference.
    if not jnp.allclose(out, ref, atol=5e-2, rtol=5e-2):
        err = float(jnp.max(jnp.abs(out - ref)))
        raise AssertionError(
            f"Pallas TheModelClass forward mismatch vs reference (max |err|={err})")
    print("KERNEL_OK")
</pallas_src>

<mosaic_0001>
module attributes {stable_mosaic.version = 11 : i64} {
  func.func @_conv_relu_pool_kernel(%arg0: i32, %arg1: memref<4x75x512xbf16, #tpu.memory_space<vmem>>, %arg2: memref<6x75xbf16, #tpu.memory_space<vmem>>, %arg3: memref<6x1xf32, #tpu.memory_space<vmem>>, %arg4: memref<6x512xf32, #tpu.memory_space<vmem>>) attributes {dimension_semantics = [#tpu.dimension_semantics<parallel>], iteration_bounds = array<i64: 1>, scalar_prefetch = 0 : i64, scratch_operands = 0 : i64, tpu.core_type = #tpu.core_type<tc>, window_params = [{transform_indices = @transform_0, window_bounds = array<i64: 4, 75, 512>}, {pipeline_mode = #tpu.pipeline_mode<synchronous>, transform_indices = @transform_1, window_bounds = array<i64: 6, 75>}, {pipeline_mode = #tpu.pipeline_mode<synchronous>, transform_indices = @transform_2, window_bounds = array<i64: 6, 1>}, {transform_indices = @transform_3, window_bounds = array<i64: 6, 512>}]} {
    %c0 = arith.constant 0 : index
    %c0_0 = arith.constant 0 : index
    %0 = vector.load %arg2[%c0, %c0_0] : memref<6x75xbf16, #tpu.memory_space<vmem>>, vector<6x75xbf16>
    %c0_1 = arith.constant 0 : index
    %c0_2 = arith.constant 0 : index
    %c0_3 = arith.constant 0 : index
    %1 = vector.load %arg1[%c0_1, %c0_2, %c0_3] : memref<4x75x512xbf16, #tpu.memory_space<vmem>>, vector<1x75x512xbf16>
    %2 = vector.shape_cast %1 : vector<1x75x512xbf16> to vector<75x512xbf16>
    %cst = arith.constant dense<0.000000e+00> : vector<6x512xf32>
    %3 = tpu.matmul %0, %2, %cst {dimension_numbers = #tpu.dot_dimension_numbers<[1], [0], [0], [1], [0, 0, 1, 1], [], []>} : vector<6x75xbf16>, vector<75x512xbf16>, vector<6x512xf32> -> vector<6x512xf32>
    %c1 = arith.constant 1 : index
    %c0_4 = arith.constant 0 : index
    %c0_5 = arith.constant 0 : index
    %4 = vector.load %arg1[%c1, %c0_4, %c0_5] : memref<4x75x512xbf16, #tpu.memory_space<vmem>>, vector<1x75x512xbf16>
    %5 = vector.shape_cast %4 : vector<1x75x512xbf16> to vector<75x512xbf16>
    %cst_6 = arith.constant dense<0.000000e+00> : vector<6x512xf32>
    %6 = tpu.matmul %0, %5, %cst_6 {dimension_numbers = #tpu.dot_dimension_numbers<[1], [0], [0], [1], [0, 0, 1, 1], [], []>} : vector<6x75xbf16>, vector<75x512xbf16>, vector<6x512xf32> -> vector<6x512xf32>
    %7 = arith.maximumf %3, %6 : vector<6x512xf32>
    %c2 = arith.constant 2 : index
    %c0_7 = arith.constant 0 : index
    %c0_8 = arith.constant 0 : index
    %8 = vector.load %arg1[%c2, %c0_7, %c0_8] : memref<4x75x512xbf16, #tpu.memory_space<vmem>>, vector<1x75x512xbf16>
    %9 = vector.shape_cast %8 : vector<1x75x512xbf16> to vector<75x512xbf16>
    %cst_9 = arith.constant dense<0.000000e+00> : vector<6x512xf32>
    %10 = tpu.matmul %0, %9, %cst_9 {dimension_numbers = #tpu.dot_dimension_numbers<[1], [0], [0], [1], [0, 0, 1, 1], [], []>} : vector<6x75xbf16>, vector<75x512xbf16>, vector<6x512xf32> -> vector<6x512xf32>
    %11 = arith.maximumf %7, %10 : vector<6x512xf32>
    %c3 = arith.constant 3 : index
    %c0_10 = arith.constant 0 : index
    %c0_11 = arith.constant 0 : index
    %12 = vector.load %arg1[%c3, %c0_10, %c0_11] : memref<4x75x512xbf16, #tpu.memory_space<vmem>>, vector<1x75x512xbf16>
    %13 = vector.shape_cast %12 : vector<1x75x512xbf16> to vector<75x512xbf16>
    %cst_12 = arith.constant dense<0.000000e+00> : vector<6x512xf32>
    %14 = tpu.matmul %0, %13, %cst_12 {dimension_numbers = #tpu.dot_dimension_numbers<[1], [0], [0], [1], [0, 0, 1, 1], [], []>} : vector<6x75xbf16>, vector<75x512xbf16>, vector<6x512xf32> -> vector<6x512xf32>
    %15 = arith.maximumf %11, %14 : vector<6x512xf32>
    %c0_13 = arith.constant 0 : index
    %c0_14 = arith.constant 0 : index
    %16 = vector.load %arg3[%c0_13, %c0_14] : memref<6x1xf32, #tpu.memory_space<vmem>>, vector<6x1xf32>
    %17 = vector.broadcast %16 : vector<6x1xf32> to vector<6x512xf32>
    %18 = arith.addf %15, %17 : vector<6x512xf32>
    %cst_15 = arith.constant 0.000000e+00 : f32
    %19 = vector.broadcast %cst_15 : f32 to vector<6x512xf32>
    %20 = arith.maximumf %18, %19 : vector<6x512xf32>
    %c0_16 = arith.constant 0 : index
    %c0_17 = arith.constant 0 : index
    %21 = vector.load %arg4[%c0_16, %c0_17] : memref<6x512xf32, #tpu.memory_space<vmem>>, vector<6x512xf32>
    tpu.vector_store %arg4[%c0_16, %c0_17], %20 {strides = array<i32>} : memref<6x512xf32, #tpu.memory_space<vmem>>, vector<6x512xf32>,
    return
  }
  func.func @transform_0(%arg0: i32) -> (i32, i32, i32) {
    %c0_i32 = arith.constant 0 : i32
    %c0_i32_0 = arith.constant 0 : i32
    %c0_i32_1 = arith.constant 0 : i32
    return %c0_i32, %c0_i32_0, %arg0 : i32, i32, i32
  }
  func.func @transform_1(%arg0: i32) -> (i32, i32) {
    %c0_i32 = arith.constant 0 : i32
    %c0_i32_0 = arith.constant 0 : i32
    %c0_i32_1 = arith.constant 0 : i32
    return %c0_i32, %c0_i32_0 : i32, i32
  }
  func.func @transform_2(%arg0: i32) -> (i32, i32) {
    %c0_i32 = arith.constant 0 : i32
    %c0_i32_0 = arith.constant 0 : i32
    %c0_i32_1 = arith.constant 0 : i32
    return %c0_i32, %c0_i32_0 : i32, i32
  }
  func.func @transform_3(%arg0: i32) -> (i32, i32) {
    %c0_i32 = arith.constant 0 : i32
    %c0_i32_0 = arith.constant 0 : i32
    return %c0_i32, %arg0 : i32, i32
  }
}

module attributes {stable_mosaic.version = 11 : i64} {
  func.func @_conv_relu_pool_kernel(%arg0: i32, %arg1: memref<4x150x256xbf16, #tpu.memory_space<vmem>>, %arg2: memref<16x150xbf16, #tpu.memory_space<vmem>>, %arg3: memref<16x1xf32, #tpu.memory_space<vmem>>, %arg4: memref<16x256xf32, #tpu.memory_space<vmem>>) attributes {dimension_semantics = [#tpu.dimension_semantics<parallel>], iteration_bounds = array<i64: 1>, scalar_prefetch = 0 : i64, scratch_operands = 0 : i64, tpu.core_type = #tpu.core_type<tc>, window_params = [{transform_indices = @transform_0, window_bounds = array<i64: 4, 150, 256>}, {pipeline_mode = #tpu.pipeline_mode<synchronous>, transform_indices = @transform_1, window_bounds = array<i64: 16, 150>}, {pipeline_mode = #tpu.pipeline_mode<synchronous>, transform_indices = @transform_2, window_bounds = array<i64: 16, 1>}, {transform_indices = @transform_3, window_bounds = array<i64: 16, 256>}]} {
    %c0 = arith.constant 0 : index
    %c0_0 = arith.constant 0 : index
    %0 = vector.load %arg2[%c0, %c0_0] : memref<16x150xbf16, #tpu.memory_space<vmem>>, vector<16x150xbf16>
    %c0_1 = arith.constant 0 : index
    %c0_2 = arith.constant 0 : index
    %c0_3 = arith.constant 0 : index
    %1 = vector.load %arg1[%c0_1, %c0_2, %c0_3] : memref<4x150x256xbf16, #tpu.memory_space<vmem>>, vector<1x150x256xbf16>
    %2 = vector.shape_cast %1 : vector<1x150x256xbf16> to vector<150x256xbf16>
    %cst = arith.constant dense<0.000000e+00> : vector<16x256xf32>
    %3 = tpu.matmul %0, %2, %cst {dimension_numbers = #tpu.dot_dimension_numbers<[1], [0], [0], [1], [0, 0, 1, 1], [], []>} : vector<16x150xbf16>, vector<150x256xbf16>, vector<16x256xf32> -> vector<16x256xf32>
    %c1 = arith.constant 1 : index
    %c0_4 = arith.constant 0 : index
    %c0_5 = arith.constant 0 : index
    %4 = vector.load %arg1[%c1, %c0_4, %c0_5] : memref<4x150x256xbf16, #tpu.memory_space<vmem>>, vector<1x150x256xbf16>
    %5 = vector.shape_cast %4 : vector<1x150x256xbf16> to vector<150x256xbf16>
    %cst_6 = arith.constant dense<0.000000e+00> : vector<16x256xf32>
    %6 = tpu.matmul %0, %5, %cst_6 {dimension_numbers = #tpu.dot_dimension_numbers<[1], [0], [0], [1], [0, 0, 1, 1], [], []>} : vector<16x150xbf16>, vector<150x256xbf16>, vector<16x256xf32> -> vector<16x256xf32>
    %7 = arith.maximumf %3, %6 : vector<16x256xf32>
    %c2 = arith.constant 2 : index
    %c0_7 = arith.constant 0 : index
    %c0_8 = arith.constant 0 : index
    %8 = vector.load %arg1[%c2, %c0_7, %c0_8] : memref<4x150x256xbf16, #tpu.memory_space<vmem>>, vector<1x150x256xbf16>
    %9 = vector.shape_cast %8 : vector<1x150x256xbf16> to vector<150x256xbf16>
    %cst_9 = arith.constant dense<0.000000e+00> : vector<16x256xf32>
    %10 = tpu.matmul %0, %9, %cst_9 {dimension_numbers = #tpu.dot_dimension_numbers<[1], [0], [0], [1], [0, 0, 1, 1], [], []>} : vector<16x150xbf16>, vector<150x256xbf16>, vector<16x256xf32> -> vector<16x256xf32>
    %11 = arith.maximumf %7, %10 : vector<16x256xf32>
    %c3 = arith.constant 3 : index
    %c0_10 = arith.constant 0 : index
    %c0_11 = arith.constant 0 : index
    %12 = vector.load %arg1[%c3, %c0_10, %c0_11] : memref<4x150x256xbf16, #tpu.memory_space<vmem>>, vector<1x150x256xbf16>
    %13 = vector.shape_cast %12 : vector<1x150x256xbf16> to vector<150x256xbf16>
    %cst_12 = arith.constant dense<0.000000e+00> : vector<16x256xf32>
    %14 = tpu.matmul %0, %13, %cst_12 {dimension_numbers = #tpu.dot_dimension_numbers<[1], [0], [0], [1], [0, 0, 1, 1], [], []>} : vector<16x150xbf16>, vector<150x256xbf16>, vector<16x256xf32> -> vector<16x256xf32>
    %15 = arith.maximumf %11, %14 : vector<16x256xf32>
    %c0_13 = arith.constant 0 : index
    %c0_14 = arith.constant 0 : index
    %16 = vector.load %arg3[%c0_13, %c0_14] : memref<16x1xf32, #tpu.memory_space<vmem>>, vector<16x1xf32>
    %17 = vector.broadcast %16 : vector<16x1xf32> to vector<16x256xf32>
    %18 = arith.addf %15, %17 : vector<16x256xf32>
    %cst_15 = arith.constant 0.000000e+00 : f32
    %19 = vector.broadcast %cst_15 : f32 to vector<16x256xf32>
    %20 = arith.maximumf %18, %19 : vector<16x256xf32>
    %c0_16 = arith.constant 0 : index
    %c0_17 = arith.constant 0 : index
    %21 = vector.load %arg4[%c0_16, %c0_17] : memref<16x256xf32, #tpu.memory_space<vmem>>, vector<16x256xf32>
    tpu.vector_store %arg4[%c0_16, %c0_17], %20 {strides = array<i32>} : memref<16x256xf32, #tpu.memory_space<vmem>>, vector<16x256xf32>,
    return
  }
  func.func @transform_0(%arg0: i32) -> (i32, i32, i32) {
    %c0_i32 = arith.constant 0 : i32
    %c0_i32_0 = arith.constant 0 : i32
    %c0_i32_1 = arith.constant 0 : i32
    return %c0_i32, %c0_i32_0, %arg0 : i32, i32, i32
  }
  func.func @transform_1(%arg0: i32) -> (i32, i32) {
    %c0_i32 = arith.constant 0 : i32
    %c0_i32_0 = arith.constant 0 : i32
    %c0_i32_1 = arith.constant 0 : i32
    return %c0_i32, %c0_i32_0 : i32, i32
  }
  func.func @transform_2(%arg0: i32) -> (i32, i32) {
    %c0_i32 = arith.constant 0 : i32
    %c0_i32_0 = arith.constant 0 : i32
    %c0_i32_1 = arith.constant 0 : i32
    return %c0_i32, %c0_i32_0 : i32, i32
  }
  func.func @transform_3(%arg0: i32) -> (i32, i32) {
    %c0_i32 = arith.constant 0 : i32
    %c0_i32_0 = arith.constant 0 : i32
    return %c0_i32, %arg0 : i32, i32
  }
}

module attributes {stable_mosaic.version = 11 : i64} {
  func.func @_mlp_kernel(%arg0: i32, %arg1: memref<2x400xbf16, #tpu.memory_space<vmem>>, %arg2: memref<400x120xbf16, #tpu.memory_space<vmem>>, %arg3: memref<1x120xf32, #tpu.memory_space<vmem>>, %arg4: memref<120x84xbf16, #tpu.memory_space<vmem>>, %arg5: memref<1x84xf32, #tpu.memory_space<vmem>>, %arg6: memref<84x10xbf16, #tpu.memory_space<vmem>>, %arg7: memref<1x10xf32, #tpu.memory_space<vmem>>, %arg8: memref<2x10xf32, #tpu.memory_space<vmem>>) attributes {dimension_semantics = [#tpu.dimension_semantics<parallel>], iteration_bounds = array<i64: 1>, scalar_prefetch = 0 : i64, scratch_operands = 0 : i64, tpu.core_type = #tpu.core_type<tc>, window_params = [{transform_indices = @transform_0, window_bounds = array<i64: 2, 400>}, {pipeline_mode = #tpu.pipeline_mode<synchronous>, transform_indices = @transform_1, window_bounds = array<i64: 400, 120>}, {pipeline_mode = #tpu.pipeline_mode<synchronous>, transform_indices = @transform_2, window_bounds = array<i64: 1, 120>}, {pipeline_mode = #tpu.pipeline_mode<synchronous>, transform_indices = @transform_3, window_bounds = array<i64: 120, 84>}, {pipeline_mode = #tpu.pipeline_mode<synchronous>, transform_indices = @transform_4, window_bounds = array<i64: 1, 84>}, {pipeline_mode = #tpu.pipeline_mode<synchronous>, transform_indices = @transform_5, window_bounds = array<i64: 84, 10>}, {pipeline_mode = #tpu.pipeline_mode<synchronous>, transform_indices = @transform_6, window_bounds = array<i64: 1, 10>}, {transform_indices = @transform_7, window_bounds = array<i64: 2, 10>}]} {
    %c0 = arith.constant 0 : index
    %c0_0 = arith.constant 0 : index
    %0 = vector.load %arg1[%c0, %c0_0] : memref<2x400xbf16, #tpu.memory_space<vmem>>, vector<2x400xbf16>
    %c0_1 = arith.constant 0 : index
    %c0_2 = arith.constant 0 : index
    %1 = vector.load %arg2[%c0_1, %c0_2] : memref<400x120xbf16, #tpu.memory_space<vmem>>, vector<400x120xbf16>
    %cst = arith.constant dense<0.000000e+00> : vector<2x120xf32>
    %2 = tpu.matmul %0, %1, %cst {dimension_numbers = #tpu.dot_dimension_numbers<[1], [0], [0], [1], [0, 0, 1, 1], [], []>} : vector<2x400xbf16>, vector<400x120xbf16>, vector<2x120xf32> -> vector<2x120xf32>
    %c0_3 = arith.constant 0 : index
    %c0_4 = arith.constant 0 : index
    %3 = vector.load %arg3[%c0_3, %c0_4] : memref<1x120xf32, #tpu.memory_space<vmem>>, vector<1x120xf32>
    %4 = vector.broadcast %3 : vector<1x120xf32> to vector<2x120xf32>
    %5 = arith.addf %2, %4 : vector<2x120xf32>
    %cst_5 = arith.constant 0.000000e+00 : f32
    %6 = vector.broadcast %cst_5 : f32 to vector<2x120xf32>
    %7 = arith.maximumf %5, %6 : vector<2x120xf32>
    %8 = arith.truncf %7 : vector<2x120xf32> to vector<2x120xbf16>
    %c0_6 = arith.constant 0 : index
    %c0_7 = arith.constant 0 : index
    %9 = vector.load %arg4[%c0_6, %c0_7] : memref<120x84xbf16, #tpu.memory_space<vmem>>, vector<120x84xbf16>
    %cst_8 = arith.constant dense<0.000000e+00> : vector<2x84xf32>
    %10 = tpu.matmul %8, %9, %cst_8 {dimension_numbers = #tpu.dot_dimension_numbers<[1], [0], [0], [1], [0, 0, 1, 1], [], []>} : vector<2x120xbf16>, vector<120x84xbf16>, vector<2x84xf32> -> vector<2x84xf32>
    %c0_9 = arith.constant 0 : index
    %c0_10 = arith.constant 0 : index
    %11 = vector.load %arg5[%c0_9, %c0_10] : memref<1x84xf32, #tpu.memory_space<vmem>>, vector<1x84xf32>
    %12 = vector.broadcast %11 : vector<1x84xf32> to vector<2x84xf32>
    %13 = arith.addf %10, %12 : vector<2x84xf32>
    %cst_11 = arith.constant 0.000000e+00 : f32
    %14 = vector.broadcast %cst_11 : f32 to vector<2x84xf32>
    %15 = arith.maximumf %13, %14 : vector<2x84xf32>
    %16 = arith.truncf %15 : vector<2x84xf32> to vector<2x84xbf16>
    %c0_12 = arith.constant 0 : index
    %c0_13 = arith.constant 0 : index
    %17 = vector.load %arg6[%c0_12, %c0_13] : memref<84x10xbf16, #tpu.memory_space<vmem>>, vector<84x10xbf16>
    %cst_14 = arith.constant dense<0.000000e+00> : vector<2x10xf32>
    %18 = tpu.matmul %16, %17, %cst_14 {dimension_numbers = #tpu.dot_dimension_numbers<[1], [0], [0], [1], [0, 0, 1, 1], [], []>} : vector<2x84xbf16>, vector<84x10xbf16>, vector<2x10xf32> -> vector<2x10xf32>
    %c0_15 = arith.constant 0 : index
    %c0_16 = arith.constant 0 : index
    %19 = vector.load %arg7[%c0_15, %c0_16] : memref<1x10xf32, #tpu.memory_space<vmem>>, vector<1x10xf32>
    %20 = vector.broadcast %19 : vector<1x10xf32> to vector<2x10xf32>
    %21 = arith.addf %18, %20 : vector<2x10xf32>
    %c0_17 = arith.constant 0 : index
    %c0_18 = arith.constant 0 : index
    %22 = vector.load %arg8[%c0_17, %c0_18] : memref<2x10xf32, #tpu.memory_space<vmem>>, vector<2x10xf32>
    tpu.vector_store %arg8[%c0_17, %c0_18], %21 {strides = array<i32>} : memref<2x10xf32, #tpu.memory_space<vmem>>, vector<2x10xf32>,
    return
  }
  func.func @transform_0(%arg0: i32) -> (i32, i32) {
    %c0_i32 = arith.constant 0 : i32
    %c0_i32_0 = arith.constant 0 : i32
    return %arg0, %c0_i32 : i32, i32
  }
  func.func @transform_1(%arg0: i32) -> (i32, i32) {
    %c0_i32 = arith.constant 0 : i32
    %c0_i32_0 = arith.constant 0 : i32
    %c0_i32_1 = arith.constant 0 : i32
    return %c0_i32, %c0_i32_0 : i32, i32
  }
  func.func @transform_2(%arg0: i32) -> (i32, i32) {
    %c0_i32 = arith.constant 0 : i32
    %c0_i32_0 = arith.constant 0 : i32
    %c0_i32_1 = arith.constant 0 : i32
    return %c0_i32, %c0_i32_0 : i32, i32
  }
  func.func @transform_3(%arg0: i32) -> (i32, i32) {
    %c0_i32 = arith.constant 0 : i32
    %c0_i32_0 = arith.constant 0 : i32
    %c0_i32_1 = arith.constant 0 : i32
    return %c0_i32, %c0_i32_0 : i32, i32
  }
  func.func @transform_4(%arg0: i32) -> (i32, i32) {
    %c0_i32 = arith.constant 0 : i32
    %c0_i32_0 = arith.constant 0 : i32
    %c0_i32_1 = arith.constant 0 : i32
    return %c0_i32, %c0_i32_0 : i32, i32
  }
  func.func @transform_5(%arg0: i32) -> (i32, i32) {
    %c0_i32 = arith.constant 0 : i32
    %c0_i32_0 = arith.constant 0 : i32
    %c0_i32_1 = arith.constant 0 : i32
    return %c0_i32, %c0_i32_0 : i32, i32
  }
  func.func @transform_6(%arg0: i32) -> (i32, i32) {
    %c0_i32 = arith.constant 0 : i32
    %c0_i32_0 = arith.constant 0 : i32
    %c0_i32_1 = arith.constant 0 : i32
    return %c0_i32, %c0_i32_0 : i32, i32
  }
  func.func @transform_7(%arg0: i32) -> (i32, i32) {
    %c0_i32 = arith.constant 0 : i32
    %c0_i32_0 = arith.constant 0 : i32
    return %arg0, %c0_i32 : i32, i32
  }
}

</mosaic_0001>

<bundles_post_ra>
// kernel: the_model_forward.3
= control target key start
LH: loop header
LB: loop body
LE: loop exit
PB: predicated region body
PF: predicated region fallthrough
CT: control target
= control target key end

     0   :  { %v1172_v1 = vmov 0   ;;  %vm136_vm0 = vcmask 1044480   ;;  %vm137_vm1 = vcmask 1045504   ;;  %v1173_v10 = vmov 65535   ;;  %s1497_s0 = inlined_call_operand.vmem [shape: bf16[4,75,512], index: 0, kind: input, shape index: {}]   ;;  %s1498_s1 = inlined_call_operand.vmem [shape: bf16[6,75], index: 1, kind: input, shape index: {}]   ;;  %s1499_s2 = inlined_call_operand.vmem [shape: f32[6,1], index: 2, kind: input, shape index: {}]   ;;  %s1500_s3 = inlined_call_operand.vmem [shape: f32[6,512], index: 3, kind: output, shape index: {}]  }
   0x1   :  { %v1052_v0 = vld [vmem:[%s1497_s0 + $0x4] ss:$16 sps:$4 sm:$0xff]   ;;  %184 = vmatprep.mubr.bf16.mxu0 %v1172_v1  ;;  %225 = vmatprep.mubr.bf16.mxu1 %v1172_v1  ;;  %v1054_v2 = vld [vmem:[%s1497_s0 + $0xc] ss:$16 sps:$4 sm:$0xff]   ;;  %v1056_v3 = vld [vmem:[%s1497_s0] ss:$16 sps:$4 sm:$0xff]  }
   0x2   :  { %1051 = vset.pattern.permute.xlu0 %v1172_v1  ;;  %152 = vmatprep.subr.bf16.mxu0 %v1052_v0  ;;  %v1057_v4 = vld [vmem:[%s1497_s0 + $0x8] ss:$16 sps:$4 sm:$0xff]   ;;  %v1058_v5 = vld [vmem:[%s1497_s0 + $0x24] ss:$16 sps:$4 sm:$0xff]   ;;  %v1060_v6 = vld [vmem:[%s1497_s0 + $0x2c] ss:$16 sps:$4 sm:$0xff]  }
   0x3   :  { %193 = vmatprep.subr.bf16.mxu1 %v1054_v2  ;;  %153 = vmatpush1.bf16.msra.mxu0 %v1056_v3  ;;  %v1062_v7 = vld [vmem:[%s1497_s0 + $0x20] ss:$16 sps:$4 sm:$0xff]   ;;  %v1063_v8 = vld [vmem:[%s1497_s0 + $0x28] ss:$16 sps:$4 sm:$0xff]   ;;  %v1064_v9 = vld [vmem:[%s1497_s0 + $0x44] ss:$16 sps:$4 sm:$0xff]  }
   0x4   :  { %194 = vmatpush1.bf16.msra.mxu1 %v1057_v4  ;;  %154 = vmatprep.subr.bf16.mxu0 %v1058_v5  ;;  %v138_v11 = vsel %vm136_vm0, 4294967295, %v1173_v10  ;;  %v1066_v12 = vld [vmem:[%s1497_s0 + $0x4c] ss:$16 sps:$4 sm:$0xff]   ;;  %v1068_v13 = vld [vmem:[%s1497_s0 + $0x40] ss:$16 sps:$4 sm:$0xff]   ;;  %vm132_vm2 = vcmask 613376  }
   0x5   :  { %195 = vmatprep.subr.bf16.mxu1 %v1060_v6  ;;  %v1069_v14 = vld [vmem:[%s1497_s0 + $0x48] ss:$16 sps:$4 sm:$0xff]   ;;  %v1070_v15 = vld [vmem:[%s1497_s0 + $0x64] ss:$16 sps:$4 sm:$0xff]   ;;  %v1072_v16 = vld [vmem:[%s1497_s0 + $0x6c] ss:$16 sps:$4 sm:$0xff]  }
   0x6   :  { %v1074_v17 = vld [vmem:[%s1497_s0 + $0x60] ss:$16 sps:$4 sm:$0xff]   ;;  %v1075_v18 = vld [vmem:[%s1497_s0 + $0x68] ss:$16 sps:$4 sm:$0xff]   ;;  %v1245_v19 = vsel %vm137_vm1, %v138_v11, 0 }
   0x7   :  { %155 = vmatpush1.bf16.msra.mxu0 %v1062_v7  ;;  %v1076_v20 = vld [vmem:[%s1497_s0 + $0x84] ss:$16 sps:$4 sm:$0x3f]   ;;  %v1078_v21 = vld [vmem:[%s1497_s0 + $0x8c] ss:$16 sps:$4 sm:$0x3f]  }
   0x8   :  { %196 = vmatpush1.bf16.msra.mxu1 %v1063_v8  ;;  %156 = vmatprep.subr.bf16.mxu0 %v1064_v9  ;;  %v144_v22 = vand.u32 %v1076_v20, %v1245_v19  ;;  %v1080_v23 = vld [vmem:[%s1497_s0 + $0x80] ss:$16 sps:$4 sm:$0x3f]   ;;  %v1081_v24 = vld [vmem:[%s1497_s0 + $0x88] ss:$16 sps:$4 sm:$0x3f]   ;;  %v150_v25 = vand.u32 %v1078_v21, %v1245_v19 }
   0x9   :  { %197 = vmatprep.subr.bf16.mxu1 %v1066_v12  ;;  %v141_v26 = vand.u32 %v1080_v23, %v1245_v19  ;;  %v147_v27 = vand.u32 %v1081_v24, %v1245_v19  ;;  %v1084_v28 = vld [vmem:[%s1497_s0 + $0xa4] ss:$16 sps:$4 sm:$0xff]   ;;  %v1087_v29 = vld [vmem:[%s1497_s0 + $0xac] ss:$16 sps:$4 sm:$0xff]   ;;  %v1272_v30 = vld [vmem:[%s1498_s1] sm:$0x7] }
   0xa   :  { %v1082_v31 = vld [vmem:[%s1497_s0 + $0xa0] ss:$16 sps:$4 sm:$0xff]   ;;  %v1085_v32 = vld [vmem:[%s1497_s0 + $0xa8] ss:$16 sps:$4 sm:$0xff]   ;;  %v1090_v33 = vld [vmem:[%s1497_s0 + $0xc4] ss:$16 sps:$4 sm:$0xff]  }
   0xb   :  { %157 = vmatpush1.bf16.msra.mxu0 %v1068_v13  ;;  %v1093_v34 = vld [vmem:[%s1497_s0 + $0xcc] ss:$16 sps:$4 sm:$0xff]   ;;  %v1088_v35 = vld [vmem:[%s1497_s0 + $0xc0] ss:$16 sps:$4 sm:$0xff]   ;;  %v1091_v36 = vld [vmem:[%s1497_s0 + $0xc8] ss:$16 sps:$4 sm:$0xff]  }
   0xc   :  { %198 = vmatpush1.bf16.msra.mxu1 %v1069_v14  ;;  %158 = vmatprep.subr.bf16.mxu0 %v1070_v15  ;;  %v1096_v37 = vld [vmem:[%s1497_s0 + $0xe4] ss:$16 sps:$4 sm:$0xff]   ;;  %v1099_v38 = vld [vmem:[%s1497_s0 + $0xec] ss:$16 sps:$4 sm:$0xff]   ;;  %v1094_v39 = vld [vmem:[%s1497_s0 + $0xe0] ss:$16 sps:$4 sm:$0xff]  }
   0xd   :  { %199 = vmatprep.subr.bf16.mxu1 %v1072_v16  ;;  %v1097_v40 = vld [vmem:[%s1497_s0 + $0xe8] ss:$16 sps:$4 sm:$0xff]   ;;  %v1102_v41 = vld [vmem:[%s1497_s0 + $0x104] ss:$16 sps:$4 sm:$0xff]   ;;  %v1105_v42 = vld [vmem:[%s1497_s0 + $0x10c] ss:$16 sps:$4 sm:$0xff]  }
   0xe   :  { %v1108_v43 = vld [vmem:[%s1497_s0 + $0x124] ss:$16 sps:$4 sm:$0x3f]   ;;  %v1111_v44 = vld [vmem:[%s1497_s0 + $0x12c] ss:$16 sps:$4 sm:$0x3f]  }
   0xf   :  { %159 = vmatpush1.bf16.msra.mxu0 %v1074_v17  ;;  %v1100_v45 = vld [vmem:[%s1497_s0 + $0x100] ss:$16 sps:$4 sm:$0xff]   ;;  %v1103_v47 = vld [vmem:[%s1497_s0 + $0x108] ss:$16 sps:$4 sm:$0xff]   ;;  %v355_v49 = vand.u32 %v1108_v43, %v1245_v19  ;;  %v361_v50 = vand.u32 %v1111_v44, %v1245_v19  ;;  %v1114_v53 = vld [vmem:[%s1497_s0 + $0x144] ss:$16 sps:$4 sm:$0xff]  }
  0x10   :  { %200 = vmatpush1.bf16.msra.mxu1 %v1075_v18  ;;  %160 = vmatprep.subr.bf16.mxu0 %v144_v22  ;;  %v1106_v46 = vld [vmem:[%s1497_s0 + $0x120] ss:$16 sps:$4 sm:$0x3f]   ;;  %v1109_v48 = vld [vmem:[%s1497_s0 + $0x128] ss:$16 sps:$4 sm:$0x3f]  }
  0x11   :  { %201 = vmatprep.subr.bf16.mxu1 %v150_v25  ;;  %v352_v51 = vand.u32 %v1106_v46, %v1245_v19  ;;  %v358_v52 = vand.u32 %v1109_v48, %v1245_v19  ;;  %v1117_v54 = vld [vmem:[%s1497_s0 + $0x14c] ss:$16 sps:$4 sm:$0xff]   ;;  %v1112_v55 = vld [vmem:[%s1497_s0 + $0x140] ss:$16 sps:$4 sm:$0xff]   ;;  %v1115_v56 = vld [vmem:[%s1497_s0 + $0x148] ss:$16 sps:$4 sm:$0xff]  }
  0x12   :  { %v1120_v57 = vld [vmem:[%s1497_s0 + $0x164] ss:$16 sps:$4 sm:$0xff]   ;;  %v1123_v58 = vld [vmem:[%s1497_s0 + $0x16c] ss:$16 sps:$4 sm:$0xff]   ;;  %v1118_v59 = vld [vmem:[%s1497_s0 + $0x160] ss:$16 sps:$4 sm:$0xff]  }
  0x13   :  { %161 = vmatpush1.bf16.msra.mxu0 %v141_v26  ;;  %v1121_v60 = vld [vmem:[%s1497_s0 + $0x168] ss:$16 sps:$4 sm:$0xff]   ;;  %v1126_v61 = vld [vmem:[%s1497_s0 + $0x184] ss:$16 sps:$4 sm:$0xff]   ;;  %v1129_v62 = vld [vmem:[%s1497_s0 + $0x18c] ss:$16 sps:$4 sm:$0xff]  }
  0x14   :  { %202 = vmatpush1.bf16.msra.mxu1 %v147_v27  ;;  %363 = vmatprep.subr.bf16.mxu0 %v1084_v28  ;;  %v1124_v63 = vld [vmem:[%s1497_s0 + $0x180] ss:$16 sps:$4 sm:$0xff]   ;;  %v1127_v0 = vld [vmem:[%s1497_s0 + $0x188] ss:$16 sps:$4 sm:$0xff]   ;;  %v1132_v2 = vld [vmem:[%s1497_s0 + $0x1a4] ss:$16 sps:$4 sm:$0xff]  }
  0x15   :  { %404 = vmatprep.subr.bf16.mxu1 %v1087_v29  ;;  %v1135_v3 = vld [vmem:[%s1497_s0 + $0x1ac] ss:$16 sps:$4 sm:$0xff]   ;;  %v1138_v4 = vld [vmem:[%s1497_s0 + $0x1c4] ss:$16 sps:$4 sm:$0x3f]  }
  0x16   :  { %921 = vmatmul.mubr.msk.bf16.vlgmr.msra.gmra.mrb[0].mxu0 %vm132_vm2, %v1272_v30  ;;  %v1141_v5 = vld [vmem:[%s1497_s0 + $0x1cc] ss:$16 sps:$4 sm:$0x3f]   ;;  %v1130_v6 = vld [vmem:[%s1497_s0 + $0x1a0] ss:$16 sps:$4 sm:$0xff]   ;;  %v570_v10 = vand.u32 %v1138_v4, %v1245_v19 }
  0x17   :  { %922 = vmatmul.mubr.msk.bf16.vlgmr.msra.gmra.mrb[0].mxu1 %vm132_vm2, %v1272_v30  ;;  %364 = vmatpush1.bf16.msra.mxu0 %v1082_v31  ;;  %v1133_v7 = vld [vmem:[%s1497_s0 + $0x1a8] ss:$16 sps:$4 sm:$0xff]   ;;  %v1136_v8 = vld [vmem:[%s1497_s0 + $0x1c0] ss:$16 sps:$4 sm:$0x3f]   ;;  %v576_v11 = vand.u32 %v1141_v5, %v1245_v19 }
  0x18   :  { %405 = vmatpush1.bf16.msra.mxu1 %v1085_v32  ;;  %365 = vmatprep.subr.bf16.mxu0 %v1090_v33  ;;  %v1139_v9 = vld [vmem:[%s1497_s0 + $0x1c8] ss:$16 sps:$4 sm:$0x3f]   ;;  %v879_v12 = vld [vmem:[%s1499_s2] sm:$0x3f]  ;;  %v567_v13 = vand.u32 %v1136_v8, %v1245_v19 }
  0x19   :  { %406 = vmatprep.subr.bf16.mxu1 %v1093_v34  ;;  %395 = vmatprep.mubr.bf16.mxu0 %v1172_v1  ;;  %v573_v14 = vand.u32 %v1139_v9, %v1245_v19  ;;  %v1144_v15 = vld [vmem:[%s1497_s0 + $0x1e4] ss:$16 sps:$4 sm:$0xff]   ;;  %v1147_v16 = vld [vmem:[%s1497_s0 + $0x1ec] ss:$16 sps:$4 sm:$0xff]   ;;  %v1142_v17 = vld [vmem:[%s1497_s0 + $0x1e0] ss:$16 sps:$4 sm:$0xff]  }
  0x1a   :  { %436 = vmatprep.mubr.bf16.mxu1 %v1172_v1  ;;  %882 = vperm.xlu0 %1051, %v879_v12   ;;  %v1145_v18 = vld [vmem:[%s1497_s0 + $0x1e8] ss:$16 sps:$4 sm:$0xff]   ;;  %v1150_v20 = vld [vmem:[%s1497_s0 + $0x204] ss:$16 sps:$4 sm:$0xff]   ;;  %v1153_v21 = vld [vmem:[%s1497_s0 + $0x20c] ss:$16 sps:$4 sm:$0xff]  }
  0x1b   :  { %366 = vmatpush1.bf16.msra.mxu0 %v1088_v35  ;;  %v1148_v22 = vld [vmem:[%s1497_s0 + $0x200] ss:$16 sps:$4 sm:$0xff]   ;;  %v1151_v23 = vld [vmem:[%s1497_s0 + $0x208] ss:$16 sps:$4 sm:$0xff]   ;;  %v1156_v24 = vld [vmem:[%s1497_s0 + $0x224] ss:$16 sps:$4 sm:$0xff]  }
  0x1c   :  { %407 = vmatpush1.bf16.msra.mxu1 %v1091_v36  ;;  %367 = vmatprep.subr.bf16.mxu0 %v1096_v37  ;;  %v1159_v25 = vld [vmem:[%s1497_s0 + $0x22c] ss:$16 sps:$4 sm:$0xff]   ;;  %v1154_v26 = vld [vmem:[%s1497_s0 + $0x220] ss:$16 sps:$4 sm:$0xff]   ;;  %v1157_v27 = vld [vmem:[%s1497_s0 + $0x228] ss:$16 sps:$4 sm:$0xff]  }
  0x1d   :  { %408 = vmatprep.subr.bf16.mxu1 %v1099_v38  ;;  %v1162_v28 = vld [vmem:[%s1497_s0 + $0x244] ss:$16 sps:$4 sm:$0xff]   ;;  %v1165_v29 = vld [vmem:[%s1497_s0 + $0x24c] ss:$16 sps:$4 sm:$0xff]   ;;  %v1160_v32 = vld [vmem:[%s1497_s0 + $0x240] ss:$16 sps:$4 sm:$0xff]  }
  0x1e   :  { %v1171_v31 = vld [vmem:[%s1497_s0 + $0x26c] ss:$16 sps:$4 sm:$0x3f]   ;;  %v1163_v33 = vld [vmem:[%s1497_s0 + $0x248] ss:$16 sps:$4 sm:$0xff]  }
  0x1f   :  { %368 = vmatpush1.bf16.msra.mxu0 %v1094_v39  ;;  %v1166_v34 = vld [vmem:[%s1497_s0 + $0x260] ss:$16 sps:$4 sm:$0x3f]   ;;  %v1169_v35 = vld [vmem:[%s1497_s0 + $0x268] ss:$16 sps:$4 sm:$0x3f]   ;;  %v791_v37 = vand.u32 %v1171_v31, %v1245_v19 }
  0x20   :  { %409 = vmatpush1.bf16.msra.mxu1 %v1097_v40  ;;  %369 = vmatprep.subr.bf16.mxu0 %v1102_v41  ;;  %v782_v38 = vand.u32 %v1166_v34, %v1245_v19  ;;  %v788_v39 = vand.u32 %v1169_v35, %v1245_v19 }
  0x21   :  { %410 = vmatprep.subr.bf16.mxu1 %v1105_v42 }
  0x23   :  { %370 = vmatpush1.bf16.msra.mxu0 %v1100_v45 }
  0x24   :  { %411 = vmatpush1.bf16.msra.mxu1 %v1103_v47  ;;  %371 = vmatprep.subr.bf16.mxu0 %v355_v49 }
  0x25   :  { %412 = vmatprep.subr.bf16.mxu1 %v361_v50 }
  0x27   :  { %372 = vmatpush1.bf16.msra.mxu0 %v352_v51 }
  0x28   :  { %413 = vmatpush1.bf16.msra.mxu1 %v358_v52  ;;  %578 = vmatprep.subr.bf16.mxu0 %v1114_v53 }
  0x29   :  { %619 = vmatprep.subr.bf16.mxu1 %v1117_v54 }
  0x2a   :  { %963 = vmatmul.mubr.msk.bf16.vlgmr.msra.gmra.mrb[4].mxu0 %vm132_vm2, %v1272_v30 }
  0x2b   :  { %964 = vmatmul.mubr.msk.bf16.vlgmr.msra.gmra.mrb[4].mxu1 %vm132_vm2, %v1272_v30  ;;  %579 = vmatpush1.bf16.msra.mxu0 %v1112_v55 }
  0x2c   :  { %620 = vmatpush1.bf16.msra.mxu1 %v1115_v56  ;;  %580 = vmatprep.subr.bf16.mxu0 %v1120_v57 }
  0x2d   :  { %621 = vmatprep.subr.bf16.mxu1 %v1123_v58  ;;  %610 = vmatprep.mubr.bf16.mxu0 %v1172_v1 }
  0x2e   :  { %651 = vmatprep.mubr.bf16.mxu1 %v1172_v1 }
  0x2f   :  { %581 = vmatpush1.bf16.msra.mxu0 %v1118_v59 }
  0x30   :  { %622 = vmatpush1.bf16.msra.mxu1 %v1121_v60  ;;  %582 = vmatprep.subr.bf16.mxu0 %v1126_v61 }
  0x31   :  { %623 = vmatprep.subr.bf16.mxu1 %v1129_v62 }
  0x33   :  { %583 = vmatpush1.bf16.msra.mxu0 %v1124_v63 }
  0x34   :  { %624 = vmatpush1.bf16.msra.mxu1 %v1127_v0  ;;  %584 = vmatprep.subr.bf16.mxu0 %v1132_v2 }
  0x35   :  { %625 = vmatprep.subr.bf16.mxu1 %v1135_v3 }
  0x37   :  { %585 = vmatpush1.bf16.msra.mxu0 %v1130_v6 }
  0x38   :  { %626 = vmatpush1.bf16.msra.mxu1 %v1133_v7  ;;  %586 = vmatprep.subr.bf16.mxu0 %v570_v10 }
  0x39   :  { %627 = vmatprep.subr.bf16.mxu1 %v576_v11 }
  0x3b   :  { %587 = vmatpush1.bf16.msra.mxu0 %v567_v13 }
  0x3c   :  { %628 = vmatpush1.bf16.msra.mxu1 %v573_v14  ;;  %793 = vmatprep.subr.bf16.mxu0 %v1144_v15 }
  0x3d   :  { %834 = vmatprep.subr.bf16.mxu1 %v1147_v16 }
  0x3e   :  { %1005 = vmatmul.mubr.msk.bf16.vlgmr.msra.gmra.mrb[8].mxu0 %vm132_vm2, %v1272_v30 }
  0x3f   :  { %1006 = vmatmul.mubr.msk.bf16.vlgmr.msra.gmra.mrb[8].mxu1 %vm132_vm2, %v1272_v30  ;;  %794 = vmatpush1.bf16.msra.mxu0 %v1142_v17 }
  0x40   :  { %835 = vmatpush1.bf16.msra.mxu1 %v1145_v18  ;;  %795 = vmatprep.subr.bf16.mxu0 %v1150_v20 }
  0x41   :  { %836 = vmatprep.subr.bf16.mxu1 %v1153_v21  ;;  %825 = vmatprep.mubr.bf16.mxu0 %v1172_v1 }
  0x42   :  { %866 = vmatprep.mubr.bf16.mxu1 %v1172_v1  ;;  %v1168_v1 = vld [vmem:[%s1497_s0 + $0x264] ss:$16 sps:$4 sm:$0x3f]  }
  0x43   :  { %796 = vmatpush1.bf16.msra.mxu0 %v1148_v22  ;;  %v785_v36 = vand.u32 %v1168_v1, %v1245_v19 }
  0x44   :  { %837 = vmatpush1.bf16.msra.mxu1 %v1151_v23  ;;  %797 = vmatprep.subr.bf16.mxu0 %v1156_v24 }
  0x45   :  { %838 = vmatprep.subr.bf16.mxu1 %v1159_v25 }
  0x47   :  { %798 = vmatpush1.bf16.msra.mxu0 %v1154_v26 }
  0x48   :  { %839 = vmatpush1.bf16.msra.mxu1 %v1157_v27  ;;  %799 = vmatprep.subr.bf16.mxu0 %v1162_v28 }
  0x49   :  { %840 = vmatprep.subr.bf16.mxu1 %v1165_v29 }
  0x4b   :  { %800 = vmatpush1.bf16.msra.mxu0 %v1160_v32 }
  0x4c   :  { %841 = vmatpush1.bf16.msra.mxu1 %v1163_v33  ;;  %801 = vmatprep.subr.bf16.mxu0 %v785_v36 }
  0x4d   :  { %842 = vmatprep.subr.bf16.mxu1 %v791_v37 }
  0x4f   :  { %802 = vmatpush1.bf16.msra.mxu0 %v782_v38 }
  0x50   :  { %843 = vmatpush1.bf16.msra.mxu1 %v788_v39 }
  0x52   :  { %1047 = vmatmul.mubr.msk.bf16.vlgmr.msra.gmra.mrb[12].mxu0 %vm132_vm2, %v1272_v30 }
  0x53   :  { %1048 = vmatmul.mubr.msk.bf16.vlgmr.msra.gmra.mrb[12].mxu1 %vm132_vm2, %v1272_v30 }
  0x99   :  { %v883_v7 = vpop.permute.xlu0 %882 }
  0xe9   :  { %v186_v40 = vpop.f32.mrb[0].mxu0 }
  0xea   :  { %v227_v41 = vpop.f32.mrb[0].mxu1  ;;  %v188_v42 = vpop.f32.mrb[1].mxu0 }
  0xeb   :  { %v229_v43 = vpop.f32.mrb[1].mxu1  ;;  %v190_v44 = vpop.f32.mrb[2].mxu0 }
  0xec   :  { %v231_v45 = vpop.f32.mrb[2].mxu1  ;;  %v191_v46 = vpop.f32.mrb[3].mxu0 }
  0xed   :  { %v232_v47 = vpop.f32.mrb[3].mxu1 }
  0xfd   :  { %v397_v48 = vpop.f32.mrb[4].mxu0 }
  0xfe   :  { %v438_v19 = vpop.f32.mrb[4].mxu1  ;;  %v445_v49 = vmax.f32 %v186_v40, %v397_v48  ;;  %v399_v51 = vpop.f32.mrb[5].mxu0 }
  0xff   :  { %v447_v50 = vmax.f32 %v227_v41, %v438_v19  ;;  %v440_v52 = vpop.f32.mrb[5].mxu1  ;;  %v446_v53 = vmax.f32 %v188_v42, %v399_v51  ;;  %v401_v55 = vpop.f32.mrb[6].mxu0 }
 0x100   :  { %v448_v54 = vmax.f32 %v229_v43, %v440_v52  ;;  %v442_v56 = vpop.f32.mrb[6].mxu1  ;;  %v402_v57 = vpop.f32.mrb[7].mxu0 }
 0x101   :  { %v443_v30 = vpop.f32.mrb[7].mxu1 }
 0x111   :  { %v612_v58 = vpop.f32.mrb[8].mxu0 }
 0x112   :  { %v653_v59 = vpop.f32.mrb[8].mxu1  ;;  %v660_v60 = vmax.f32 %v445_v49, %v612_v58  ;;  %v614_v62 = vpop.f32.mrb[9].mxu0 }
 0x113   :  { %v662_v61 = vmax.f32 %v447_v50, %v653_v59  ;;  %v655_v63 = vpop.f32.mrb[9].mxu1  ;;  %v661_v0 = vmax.f32 %v446_v53, %v614_v62  ;;  %v616_v3 = vpop.f32.mrb[10].mxu0 }
 0x114   :  { %v663_v2 = vmax.f32 %v448_v54, %v655_v63  ;;  %v657_v4 = vpop.f32.mrb[10].mxu1  ;;  %v617_v5 = vpop.f32.mrb[11].mxu0 }
 0x115   :  { %v658_v6 = vpop.f32.mrb[11].mxu1 }
 0x125   :  { %v827_v8 = vpop.f32.mrb[12].mxu0 }
 0x126   :  { %v868_v9 = vpop.f32.mrb[12].mxu1  ;;  %v875_v10 = vmax.f32 %v660_v60, %v827_v8  ;;  %v829_v12 = vpop.f32.mrb[13].mxu0 }
 0x127   :  { %v877_v11 = vmax.f32 %v662_v61, %v868_v9  ;;  %v870_v13 = vpop.f32.mrb[13].mxu1  ;;  %v876_v14 = vmax.f32 %v661_v0, %v829_v12  ;;  %v831_v16 = vpop.f32.mrb[14].mxu0 }
 0x128   :  { %v878_v15 = vmax.f32 %v663_v2, %v870_v13  ;;  %v872_v17 = vpop.f32.mrb[14].mxu1  ;;  %v885_v18 = vadd.f32 %v883_v7, %v875_v10  ;;  %v832_v21 = vpop.f32.mrb[15].mxu0 }
 0x129   :  { %v887_v20 = vadd.f32 %v883_v7, %v877_v11  ;;  %v873_v22 = vpop.f32.mrb[15].mxu1  ;;  %v886_v23 = vadd.f32 %v883_v7, %v876_v14 }
 0x12a   :  { %v888_v24 = vadd.f32 %v883_v7, %v878_v15  ;;  %v889_v25 = vmax.f32 %v885_v18, 0.0 }
 0x12b   :  { %v891_v26 = vmax.f32 %v887_v20, 0.0  ;;  %v890_v27 = vmax.f32 %v886_v23, 0.0 }
 0x12c   :  { %v892_v28 = vmax.f32 %v888_v24, 0.0  ;;  %893 = vst [vmem:[%s1500_s3] sm:$0x3f] %v889_v25 }
 0x12d   :  { %895 = vst [vmem:[%s1500_s3 + $0x10] sm:$0x3f] %v891_v26  ;;  %894 = vst [vmem:[%s1500_s3 + $0x8] sm:$0x3f] %v890_v27 }
 0x12e   :  { %896 = vst [vmem:[%s1500_s3 + $0x18] sm:$0x3f] %v892_v28 }

// kernel: the_model_forward.4
= control target key start
LH: loop header
LB: loop body
LE: loop exit
PB: predicated region body
PF: predicated region fallthrough
CT: control target
= control target key end

     0   :  { %v994_v1 = vmov 0   ;;  %vm140_vm0 = vcmask 179200   ;;  %vm144_vm1 = vcmask 1042432   ;;  %s1285_s0 = inlined_call_operand.vmem [shape: bf16[4,150,256], index: 0, kind: input, shape index: {}]   ;;  %s1286_s1 = inlined_call_operand.vmem [shape: bf16[16,150], index: 1, kind: input, shape index: {}]   ;;  %s1287_s2 = inlined_call_operand.vmem [shape: f32[16,1], index: 2, kind: input, shape index: {}]   ;;  %s1288_s3 = inlined_call_operand.vmem [shape: f32[16,256], index: 3, kind: output, shape index: {}]  }
   0x1   :  { %v875_v0 = vld [vmem:[%s1285_s0 + $0x4] ss:$8 sps:$4 sm:$0xff]   ;;  %874 = vset.pattern.permute.xlu0 %v994_v1  ;;  %v879_v3 = vld [vmem:[%s1285_s0] ss:$8 sps:$4 sm:$0xff]   ;;  %v881_v5 = vld [vmem:[%s1285_s0 + $0x14] ss:$8 sps:$4 sm:$0xff]  }
   0x2   :  { %v877_v2 = vld [vmem:[%s1285_s0 + $0x9c] ss:$8 sps:$4 sm:$0xff]   ;;  %151 = vmatprep.subr.bf16.mxu0 %v875_v0  ;;  %v880_v4 = vld [vmem:[%s1285_s0 + $0x98] ss:$8 sps:$4 sm:$0xff]   ;;  %v883_v6 = vld [vmem:[%s1285_s0 + $0xac] ss:$8 sps:$4 sm:$0xff]  }
   0x3   :  { %315 = vmatprep.subr.bf16.mxu1 %v877_v2  ;;  %152 = vmatpush1.bf16.msra.mxu0 %v879_v3  ;;  %v885_v7 = vld [vmem:[%s1285_s0 + $0x10] ss:$8 sps:$4 sm:$0xff]   ;;  %v887_v9 = vld [vmem:[%s1285_s0 + $0x24] ss:$8 sps:$4 sm:$0xff]   ;;  %v891_v11 = vld [vmem:[%s1285_s0 + $0x20] ss:$8 sps:$4 sm:$0xff]  }
   0x4   :  { %316 = vmatpush1.bf16.msra.mxu1 %v880_v4  ;;  %153 = vmatprep.subr.bf16.mxu0 %v881_v5  ;;  %v886_v8 = vld [vmem:[%s1285_s0 + $0xa8] ss:$8 sps:$4 sm:$0xff]   ;;  %v889_v10 = vld [vmem:[%s1285_s0 + $0xbc] ss:$8 sps:$4 sm:$0xff]   ;;  %v892_v12 = vld [vmem:[%s1285_s0 + $0xb8] ss:$8 sps:$4 sm:$0xff]  }
   0x5   :  { %317 = vmatprep.subr.bf16.mxu1 %v883_v6  ;;  %v893_v13 = vld [vmem:[%s1285_s0 + $0x34] ss:$8 sps:$4 sm:$0xff]   ;;  %v897_v15 = vld [vmem:[%s1285_s0 + $0x30] ss:$8 sps:$4 sm:$0xff]   ;;  %v899_v17 = vld [vmem:[%s1285_s0 + $0x44] ss:$8 sps:$4 sm:$0xff]  }
   0x6   :  { %v895_v14 = vld [vmem:[%s1285_s0 + $0xcc] ss:$8 sps:$4 sm:$0xff]   ;;  %v898_v16 = vld [vmem:[%s1285_s0 + $0xc8] ss:$8 sps:$4 sm:$0xff]   ;;  %v901_v18 = vld [vmem:[%s1285_s0 + $0xdc] ss:$8 sps:$4 sm:$0xff]  }
   0x7   :  { %154 = vmatpush1.bf16.msra.mxu0 %v885_v7  ;;  %v903_v19 = vld [vmem:[%s1285_s0 + $0x40] ss:$8 sps:$4 sm:$0xff]   ;;  %v905_v21 = vld [vmem:[%s1285_s0 + $0x54] ss:$8 sps:$4 sm:$0xff]   ;;  %v909_v23 = vld [vmem:[%s1285_s0 + $0x50] ss:$8 sps:$4 sm:$0xff]  }
   0x8   :  { %318 = vmatpush1.bf16.msra.mxu1 %v886_v8  ;;  %155 = vmatprep.subr.bf16.mxu0 %v887_v9  ;;  %v904_v20 = vld [vmem:[%s1285_s0 + $0xd8] ss:$8 sps:$4 sm:$0xff]   ;;  %v907_v22 = vld [vmem:[%s1285_s0 + $0xec] ss:$8 sps:$4 sm:$0xff]   ;;  %v910_v24 = vld [vmem:[%s1285_s0 + $0xe8] ss:$8 sps:$4 sm:$0xff]  }
   0x9   :  { %319 = vmatprep.subr.bf16.mxu1 %v889_v10  ;;  %v911_v25 = vld [vmem:[%s1285_s0 + $0x64] ss:$8 sps:$4 sm:$0xff]   ;;  %v915_v27 = vld [vmem:[%s1285_s0 + $0x60] ss:$8 sps:$4 sm:$0xff]   ;;  %v917_v29 = vld [vmem:[%s1285_s0 + $0x74] ss:$8 sps:$4 sm:$0xff]  }
   0xa   :  { %v913_v26 = vld [vmem:[%s1285_s0 + $0xfc] ss:$8 sps:$4 sm:$0xff]   ;;  %v916_v28 = vld [vmem:[%s1285_s0 + $0xf8] ss:$8 sps:$4 sm:$0xff]   ;;  %v919_v30 = vld [vmem:[%s1285_s0 + $0x10c] ss:$8 sps:$4 sm:$0xff]  }
   0xb   :  { %156 = vmatpush1.bf16.msra.mxu0 %v891_v11  ;;  %v933_v31 = vld [vmem:[%s1286_s1 + $0x4] ss:$8 sps:$4 sm:$0xff]   ;;  %v921_v32 = vld [vmem:[%s1285_s0 + $0x70] ss:$8 sps:$4 sm:$0xff]   ;;  %v927_v38 = vld [vmem:[%s1285_s0 + $0x80] ss:$8 sps:$4 sm:$0xff]  }
   0xc   :  { %320 = vmatpush1.bf16.msra.mxu1 %v892_v12  ;;  %157 = vmatprep.subr.bf16.mxu0 %v893_v13  ;;  %v922_v33 = vld [vmem:[%s1285_s0 + $0x108] ss:$8 sps:$4 sm:$0xff]   ;;  %v923_v34 = vld [vmem:[%s1285_s0 + $0x84] ss:$8 sps:$4 sm:$0xff]   ;;  %v928_v39 = vld [vmem:[%s1285_s0 + $0x118] ss:$8 sps:$4 sm:$0xff]  }
   0xd   :  { %321 = vmatprep.subr.bf16.mxu1 %v895_v14  ;;  %749 = vmatprep.mubr.msk.bf16.mxu0 %vm140_vm0, %v933_v31  ;;  %v925_v35 = vld [vmem:[%s1285_s0 + $0x11c] ss:$8 sps:$4 sm:$0xff]   ;;  %v35_v36 = vld [vmem:[%s1285_s0 + $0x90] sm:$0x77]  ;;  %v768_v37 = vld [vmem:[%s1285_s0 + $0x128] sm:$0x77] }
   0xe   :  { %790 = vmatprep.mubr.msk.bf16.mxu1 %vm140_vm0, %v933_v31  ;;  %v746_v40 = vcombine.low %v35_v36, %v35_v36  ;;  %v747_v41 = vcombine.high %v35_v36, %v35_v36  ;;  %v788_v42 = vcombine.high %v768_v37, %v768_v37  ;;  %v787_v43 = vcombine.low %v768_v37, %v768_v37  ;;  %v938_v46 = vld [vmem:[%s1285_s0 + $0x134] ss:$8 sps:$4 sm:$0xff]   ;;  %v1147_v48 = vld [vmem:[%s1286_s1] ss:$8 sps:$4 sm:$0xff]   ;;  %v936_v49 = vld [vmem:[%s1285_s0 + $0x130] ss:$8 sps:$4 sm:$0xff]  }
   0xf   :  { %158 = vmatpush1.bf16.msra.mxu0 %v897_v15  ;;  %v941_v47 = vld [vmem:[%s1285_s0 + $0x1cc] ss:$8 sps:$4 sm:$0xff]   ;;  %v939_v50 = vld [vmem:[%s1285_s0 + $0x1c8] ss:$8 sps:$4 sm:$0xff]   ;;  %v947_v52 = vld [vmem:[%s1285_s0 + $0x1dc] ss:$8 sps:$4 sm:$0xff]  }
  0x10   :  { %322 = vmatpush1.bf16.msra.mxu1 %v898_v16  ;;  %159 = vmatprep.subr.bf16.mxu0 %v899_v17  ;;  %v146_v44 = vsel %vm144_vm1, %v746_v40, 0  ;;  %v310_v45 = vsel %vm144_vm1, %v787_v43, 0  ;;  %v944_v51 = vld [vmem:[%s1285_s0 + $0x144] ss:$8 sps:$4 sm:$0xff]   ;;  %v942_v53 = vld [vmem:[%s1285_s0 + $0x140] ss:$8 sps:$4 sm:$0xff]  }
  0x11   :  { %323 = vmatprep.subr.bf16.mxu1 %v901_v18  ;;  %v945_v54 = vld [vmem:[%s1285_s0 + $0x1d8] ss:$8 sps:$4 sm:$0xff]   ;;  %v950_v55 = vld [vmem:[%s1285_s0 + $0x154] ss:$8 sps:$4 sm:$0xff]   ;;  %v951_v58 = vld [vmem:[%s1285_s0 + $0x1e8] ss:$8 sps:$4 sm:$0xff]  }
  0x12   :  { %v953_v56 = vld [vmem:[%s1285_s0 + $0x1ec] ss:$8 sps:$4 sm:$0xff]   ;;  %v948_v57 = vld [vmem:[%s1285_s0 + $0x150] ss:$8 sps:$4 sm:$0xff]   ;;  %v959_v60 = vld [vmem:[%s1285_s0 + $0x1fc] ss:$8 sps:$4 sm:$0xff]  }
  0x13   :  { %160 = vmatpush1.bf16.msra.mxu0 %v903_v19  ;;  %v956_v59 = vld [vmem:[%s1285_s0 + $0x164] ss:$8 sps:$4 sm:$0xff]   ;;  %v954_v62 = vld [vmem:[%s1285_s0 + $0x160] ss:$8 sps:$4 sm:$0xff]   ;;  %v962_v1 = vld [vmem:[%s1285_s0 + $0x174] ss:$8 sps:$4 sm:$0xff]  }
  0x14   :  { %324 = vmatpush1.bf16.msra.mxu1 %v904_v20  ;;  %161 = vmatprep.subr.bf16.mxu0 %v905_v21  ;;  %v698_v61 = vld [vmem:[%s1287_s2] sm:$0xff]  ;;  %v699_v0 = vld [vmem:[%s1287_s2 + $0x8] sm:$0xff]  ;;  %v960_v3 = vld [vmem:[%s1285_s0 + $0x170] ss:$8 sps:$4 sm:$0xff]  }
  0x15   :  { %325 = vmatprep.subr.bf16.mxu1 %v907_v22  ;;  %702 = vperm.xlu0 %874, %v698_v61   ;;  %v957_v63 = vld [vmem:[%s1285_s0 + $0x1f8] ss:$8 sps:$4 sm:$0xff]   ;;  %v965_v2 = vld [vmem:[%s1285_s0 + $0x20c] ss:$8 sps:$4 sm:$0xff]   ;;  %v963_v4 = vld [vmem:[%s1285_s0 + $0x208] ss:$8 sps:$4 sm:$0xff]  }
  0x16   :  { %v968_v5 = vld [vmem:[%s1285_s0 + $0x184] ss:$8 sps:$4 sm:$0xff]   ;;  %v966_v7 = vld [vmem:[%s1285_s0 + $0x180] ss:$8 sps:$4 sm:$0xff]   ;;  %v974_v9 = vld [vmem:[%s1285_s0 + $0x194] ss:$8 sps:$4 sm:$0xff]  }
  0x17   :  { %162 = vmatpush1.bf16.msra.mxu0 %v909_v23  ;;  %v971_v6 = vld [vmem:[%s1285_s0 + $0x21c] ss:$8 sps:$4 sm:$0xff]   ;;  %v969_v8 = vld [vmem:[%s1285_s0 + $0x218] ss:$8 sps:$4 sm:$0xff]   ;;  %v977_v10 = vld [vmem:[%s1285_s0 + $0x22c] ss:$8 sps:$4 sm:$0xff]  }
  0x18   :  { %326 = vmatpush1.bf16.msra.mxu1 %v910_v24  ;;  %163 = vmatprep.subr.bf16.mxu0 %v911_v25  ;;  %v972_v11 = vld [vmem:[%s1285_s0 + $0x190] ss:$8 sps:$4 sm:$0xff]   ;;  %v980_v13 = vld [vmem:[%s1285_s0 + $0x1a4] ss:$8 sps:$4 sm:$0xff]   ;;  %v978_v15 = vld [vmem:[%s1285_s0 + $0x1a0] ss:$8 sps:$4 sm:$0xff]  }
  0x19   :  { %327 = vmatprep.subr.bf16.mxu1 %v913_v26  ;;  %707 = vperm.xlu0 %874, %v699_v0   ;;  %v975_v12 = vld [vmem:[%s1285_s0 + $0x228] ss:$8 sps:$4 sm:$0xff]   ;;  %v983_v14 = vld [vmem:[%s1285_s0 + $0x23c] ss:$8 sps:$4 sm:$0xff]   ;;  %v981_v16 = vld [vmem:[%s1285_s0 + $0x238] ss:$8 sps:$4 sm:$0xff]  }
  0x1a   :  { %v986_v17 = vld [vmem:[%s1285_s0 + $0x1b4] ss:$8 sps:$4 sm:$0xff]   ;;  %v809_v19 = vld [vmem:[%s1285_s0 + $0x1c0] sm:$0x77]  ;;  %v984_v21 = vld [vmem:[%s1285_s0 + $0x1b0] ss:$8 sps:$4 sm:$0xff]  }
  0x1b   :  { %164 = vmatpush1.bf16.msra.mxu0 %v915_v27  ;;  %v989_v18 = vld [vmem:[%s1285_s0 + $0x24c] ss:$8 sps:$4 sm:$0xff]   ;;  %v850_v20 = vld [vmem:[%s1285_s0 + $0x258] sm:$0x77]  ;;  %v987_v22 = vld [vmem:[%s1285_s0 + $0x248] ss:$8 sps:$4 sm:$0xff]   ;;  %v829_v23 = vcombine.high %v809_v19, %v809_v19  ;;  %v828_v25 = vcombine.low %v809_v19, %v809_v19 }
  0x1c   :  { %328 = vmatpush1.bf16.msra.mxu1 %v916_v28  ;;  %165 = vmatprep.subr.bf16.mxu0 %v917_v29  ;;  %v870_v24 = vcombine.high %v850_v20, %v850_v20  ;;  %v869_v26 = vcombine.low %v850_v20, %v850_v20 }
  0x1d   :  { %329 = vmatprep.subr.bf16.mxu1 %v919_v30  ;;  %v478_v27 = vsel %vm144_vm1, %v828_v25, 0 }
  0x1e   :  { %v646_v28 = vsel %vm144_vm1, %v869_v26, 0 }
  0x1f   :  { %166 = vmatpush1.bf16.msra.mxu0 %v921_v32 }
  0x20   :  { %330 = vmatpush1.bf16.msra.mxu1 %v922_v33  ;;  %167 = vmatprep.subr.bf16.mxu0 %v923_v34 }
  0x21   :  { %331 = vmatprep.subr.bf16.mxu1 %v925_v35 }
  0x23   :  { %168 = vmatpush1.bf16.msra.mxu0 %v927_v38 }
  0x24   :  { %332 = vmatpush1.bf16.msra.mxu1 %v928_v39  ;;  %748 = vmatprep.subr.msk.bf16.mxu0 %vm144_vm1, %v747_v41 }
  0x25   :  { %789 = vmatprep.subr.msk.bf16.mxu1 %vm144_vm1, %v788_v42 }
  0x27   :  { %170 = vmatpush1.bf16.msra.mxu0 %v146_v44 }
  0x28   :  { %334 = vmatpush1.bf16.msra.mxu1 %v310_v45  ;;  %483 = vmatprep.subr.bf16.mxu0 %v938_v46 }
  0x29   :  { %651 = vmatprep.subr.bf16.mxu1 %v941_v47 }
  0x2a   :  { %184 = vmatmul.mubr.bf16.vlgmr.msra.gmra.mrb[0].mxu0 %v1147_v48 }
  0x2b   :  { %348 = vmatmul.mubr.bf16.vlgmr.msra.gmra.mrb[0].mxu1 %v1147_v48  ;;  %484 = vmatpush1.bf16.msra.mxu0 %v936_v49 }
  0x2c   :  { %652 = vmatpush1.bf16.msra.mxu1 %v939_v50  ;;  %485 = vmatprep.subr.bf16.mxu0 %v944_v51 }
  0x2d   :  { %653 = vmatprep.subr.bf16.mxu1 %v947_v52  ;;  %831 = vmatprep.mubr.msk.bf16.mxu0 %vm140_vm0, %v933_v31 }
  0x2e   :  { %872 = vmatprep.mubr.msk.bf16.mxu1 %vm140_vm0, %v933_v31 }
  0x2f   :  { %486 = vmatpush1.bf16.msra.mxu0 %v942_v53 }
  0x30   :  { %654 = vmatpush1.bf16.msra.mxu1 %v945_v54  ;;  %487 = vmatprep.subr.bf16.mxu0 %v950_v55 }
  0x31   :  { %655 = vmatprep.subr.bf16.mxu1 %v953_v56 }
  0x33   :  { %488 = vmatpush1.bf16.msra.mxu0 %v948_v57 }
  0x34   :  { %656 = vmatpush1.bf16.msra.mxu1 %v951_v58  ;;  %489 = vmatprep.subr.bf16.mxu0 %v956_v59 }
  0x35   :  { %657 = vmatprep.subr.bf16.mxu1 %v959_v60 }
  0x37   :  { %490 = vmatpush1.bf16.msra.mxu0 %v954_v62 }
  0x38   :  { %658 = vmatpush1.bf16.msra.mxu1 %v957_v63  ;;  %491 = vmatprep.subr.bf16.mxu0 %v962_v1 }
  0x39   :  { %659 = vmatprep.subr.bf16.mxu1 %v965_v2 }
  0x3b   :  { %492 = vmatpush1.bf16.msra.mxu0 %v960_v3 }
  0x3c   :  { %660 = vmatpush1.bf16.msra.mxu1 %v963_v4  ;;  %493 = vmatprep.subr.bf16.mxu0 %v968_v5 }
  0x3d   :  { %661 = vmatprep.subr.bf16.mxu1 %v971_v6 }
  0x3f   :  { %494 = vmatpush1.bf16.msra.mxu0 %v966_v7 }
  0x40   :  { %662 = vmatpush1.bf16.msra.mxu1 %v969_v8  ;;  %495 = vmatprep.subr.bf16.mxu0 %v974_v9 }
  0x41   :  { %663 = vmatprep.subr.bf16.mxu1 %v977_v10 }
  0x43   :  { %496 = vmatpush1.bf16.msra.mxu0 %v972_v11 }
  0x44   :  { %664 = vmatpush1.bf16.msra.mxu1 %v975_v12  ;;  %497 = vmatprep.subr.bf16.mxu0 %v980_v13 }
  0x45   :  { %665 = vmatprep.subr.bf16.mxu1 %v983_v14 }
  0x47   :  { %498 = vmatpush1.bf16.msra.mxu0 %v978_v15 }
  0x48   :  { %666 = vmatpush1.bf16.msra.mxu1 %v981_v16  ;;  %499 = vmatprep.subr.bf16.mxu0 %v986_v17 }
  0x49   :  { %667 = vmatprep.subr.bf16.mxu1 %v989_v18 }
  0x4b   :  { %500 = vmatpush1.bf16.msra.mxu0 %v984_v21 }
  0x4c   :  { %668 = vmatpush1.bf16.msra.mxu1 %v987_v22  ;;  %830 = vmatprep.subr.msk.bf16.mxu0 %vm144_vm1, %v829_v23 }
  0x4d   :  { %871 = vmatprep.subr.msk.bf16.mxu1 %vm144_vm1, %v870_v24 }
  0x4f   :  { %502 = vmatpush1.bf16.msra.mxu0 %v478_v27 }
  0x50   :  { %670 = vmatpush1.bf16.msra.mxu1 %v646_v28 }
  0x52   :  { %516 = vmatmul.mubr.bf16.vlgmr.msra.gmra.mrb[4].mxu0 %v1147_v48 }
  0x53   :  { %684 = vmatmul.mubr.bf16.vlgmr.msra.gmra.mrb[4].mxu1 %v1147_v48 }
  0x94   :  { %v703_v41 = vpop.permute.xlu0 %702 }
  0x98   :  { %v708_v59 = vpop.permute.xlu0 %707 }
  0xfd   :  { %v185_v29 = vpop.f32.mrb[0].mxu0 }
  0xfe   :  { %v349_v30 = vpop.f32.mrb[0].mxu1  ;;  %v187_v32 = vpop.f32.mrb[1].mxu0 }
  0xff   :  { %v358_v31 = vmax.f32 %v185_v29, %v349_v30  ;;  %v351_v33 = vpop.f32.mrb[1].mxu1  ;;  %v189_v35 = vpop.f32.mrb[2].mxu0 }
 0x100   :  { %v359_v34 = vmax.f32 %v187_v32, %v351_v33  ;;  %v353_v36 = vpop.f32.mrb[2].mxu1  ;;  %v191_v38 = vpop.f32.mrb[3].mxu0 }
 0x101   :  { %v360_v37 = vmax.f32 %v189_v35, %v353_v36  ;;  %v355_v39 = vpop.f32.mrb[3].mxu1 }
 0x102   :  { %v361_v40 = vmax.f32 %v191_v38, %v355_v39 }
 0x125   :  { %v517_v42 = vpop.f32.mrb[4].mxu0 }
 0x126   :  { %v685_v43 = vpop.f32.mrb[4].mxu1  ;;  %v526_v44 = vmax.f32 %v358_v31, %v517_v42  ;;  %v519_v45 = vpop.f32.mrb[5].mxu0 }
 0x127   :  { %v687_v46 = vpop.f32.mrb[5].mxu1  ;;  %v527_v47 = vmax.f32 %v359_v34, %v519_v45  ;;  %v521_v48 = vpop.f32.mrb[6].mxu0 }
 0x128   :  { %v689_v49 = vpop.f32.mrb[6].mxu1  ;;  %v694_v50 = vmax.f32 %v526_v44, %v685_v43  ;;  %v528_v51 = vmax.f32 %v360_v37, %v521_v48  ;;  %v523_v52 = vpop.f32.mrb[7].mxu0 }
 0x129   :  { %v691_v53 = vpop.f32.mrb[7].mxu1  ;;  %v695_v54 = vmax.f32 %v527_v47, %v687_v46  ;;  %v529_v55 = vmax.f32 %v361_v40, %v523_v52 }
 0x12a   :  { %v710_v56 = vadd.f32 %v703_v41, %v694_v50  ;;  %v696_v57 = vmax.f32 %v528_v51, %v689_v49 }
 0x12b   :  { %v711_v58 = vadd.f32 %v703_v41, %v695_v54  ;;  %v697_v60 = vmax.f32 %v529_v55, %v691_v53 }
 0x12c   :  { %v714_v61 = vmax.f32 %v710_v56, 0.0  ;;  %v712_v62 = vadd.f32 %v708_v59, %v696_v57 }
 0x12d   :  { %v715_v63 = vmax.f32 %v711_v58, 0.0  ;;  %v713_v0 = vadd.f32 %v708_v59, %v697_v60 }
 0x12e   :  { %718 = vst [vmem:[%s1288_s3] sm:$0xff] %v714_v61  ;;  %v716_v1 = vmax.f32 %v712_v62, 0.0 }
 0x12f   :  { %719 = vst [vmem:[%s1288_s3 + $0x8] sm:$0xff] %v715_v63  ;;  %v717_v2 = vmax.f32 %v713_v0, 0.0 }
 0x130   :  { %720 = vst [vmem:[%s1288_s3 + $0x10] sm:$0xff] %v716_v1 }
 0x131   :  { %721 = vst [vmem:[%s1288_s3 + $0x18] sm:$0xff] %v717_v2 }

// kernel: the_model_forward.5
= control target key start
LH: loop header
LB: loop body
LE: loop exit
PB: predicated region body
PF: predicated region fallthrough
CT: control target
= control target key end

     0   :  { %v770_v1 = vmov 0   ;;  %v98_v20 = vlaneseq  ;;  %v771_v25 = vmov 1966171168   ;;  %vm264_vm0 = vcmask 130048   ;;  %s981_s0 = inlined_call_operand.vmem [shape: bf16[2,400], index: 0, kind: input, shape index: {}]   ;;  %s982_s1 = inlined_call_operand.vmem [shape: bf16[400,120], index: 1, kind: input, shape index: {}]   ;;  %s983_s2 = inlined_call_operand.vmem [shape: f32[1,120], index: 2, kind: input, shape index: {}]   ;;  %s984_s3 = inlined_call_operand.vmem [shape: bf16[120,84], index: 3, kind: input, shape index: {}]   ;;  %s985_s4 = inlined_call_operand.vmem [shape: f32[1,84], index: 4, kind: input, shape index: {}]   ;;  %s986_s5 = inlined_call_operand.vmem [shape: bf16[84,10], index: 5, kind: input, shape index: {}]   ;;  %s987_s6 = inlined_call_operand.vmem [shape: f32[1,10], index: 6, kind: input, shape index: {}]   ;;  %s988_s7 = inlined_call_operand.hbm [shape: f32[2,10], index: 7, kind: output, shape index: {}]  }
   0x1   :  { %v707_v0 = vld [vmem:[%s982_s1 + $0x40] sm:$0xff]   ;;  %308 = vmatprep.subr.bf16.mxu1 %v770_v1  ;;  %v710_v4 = vld [vmem:[%s982_s1 + $0x48] sm:$0xff]   ;;  %v713_v7 = vld [vmem:[%s982_s1 + $0x50] sm:$0xff]   ;;  %v96_v26 = vunpack.c.l.s4 %v771_v25  ;;  %v772_v38 = vmov 0.0  }
   0x2   :  { %v708_v2 = vld [vmem:[%s982_s1 + $0x80] sm:$0xff]   ;;  %628 = vmatprep.subr.bf16.mxu0 %v707_v0  ;;  %v711_v5 = vld [vmem:[%s982_s1 + $0x88] sm:$0xff]   ;;  %v714_v8 = vld [vmem:[%s982_s1 + $0x90] sm:$0xff]   ;;  %v99_v27 = vshrl.u32 %v98_v20, 7 }
   0x3   :  { %v709_v3 = vld [vmem:[%s982_s1] sm:$0xff]   ;;  %309 = vmatpush1.bf16.msra.mxu1 %v708_v2  ;;  %v712_v6 = vld [vmem:[%s982_s1 + $0x8] sm:$0xff]   ;;  %v715_v9 = vld [vmem:[%s982_s1 + $0x10] sm:$0xff]   ;;  %v97_v30 = vunpack.c.0.s8 %v96_v26 }
   0x4   :  { %629 = vmatpush3.bf16.msra.mxu0 %v709_v3  ;;  %310 = vmatprep.subr.bf16.mxu1 %v770_v1  ;;  %v716_v10 = vld [vmem:[%s982_s1 + $0x58] sm:$0xff]   ;;  %v719_v13 = vld [vmem:[%s982_s1 + $0x60] sm:$0xff]   ;;  %v722_v16 = vld [vmem:[%s982_s1 + $0x68] sm:$0xff]  }
   0x5   :  { %630 = vmatprep.subr.bf16.mxu0 %v710_v4  ;;  %v717_v11 = vld [vmem:[%s982_s1 + $0x98] sm:$0xff]   ;;  %v720_v14 = vld [vmem:[%s982_s1 + $0xa0] sm:$0xff]   ;;  %v723_v17 = vld [vmem:[%s982_s1 + $0xa8] sm:$0xff]   ;;  %v100_v32 = vsub.s32 %v97_v30, %v99_v27 }
   0x6   :  { %v718_v12 = vld [vmem:[%s982_s1 + $0x18] sm:$0xff]   ;;  %v721_v15 = vld [vmem:[%s982_s1 + $0x20] sm:$0xff]   ;;  %v724_v18 = vld [vmem:[%s982_s1 + $0x28] sm:$0xff]  }
   0x7   :  { %311 = vmatpush1.bf16.msra.mxu1 %v711_v5  ;;  %v725_v19 = vld [vmem:[%s982_s1 + $0x70] sm:$0xff]   ;;  %v583_v23 = vld.sshfl [vmem:[%s981_s0] sm:$0x33 pattern:$0x75316420]  ;;  %v728_v24 = vld [vmem:[%s982_s1 + $0x78] sm:$0xff]  }
   0x8   :  { %631 = vmatpush3.bf16.msra.mxu0 %v712_v6  ;;  %312 = vmatprep.subr.bf16.mxu1 %v770_v1  ;;  %v726_v21 = vld [vmem:[%s982_s1 + $0xb0] sm:$0xff]   ;;  %v729_v28 = vld [vmem:[%s982_s1 + $0xb8] sm:$0xff]   ;;  %v94_v29 = vcombine.high %v583_v23, %v583_v23  ;;  %v731_v33 = vld [vmem:[%s982_s1 + $0xc0] sm:$0xff]   ;;  %v101_v36 = vrot.slane %v583_v23, %v100_v32 }
   0x9   :  { %632 = vmatprep.subr.bf16.mxu0 %v713_v7  ;;  %v727_v22 = vld [vmem:[%s982_s1 + $0x30] sm:$0xff]   ;;  %v730_v31 = vld [vmem:[%s982_s1 + $0x38] sm:$0xff]   ;;  %v732_v34 = vld [vmem:[%s984_s3] sm:$0xff]  }
   0xa   :  { %v108_v35 = vrot.slane %v94_v29, %v100_v32  ;;  %v109_v39 = vcombine.high %v101_v36, %v101_v36  ;;  %v733_v40 = vld [vmem:[%s984_s3 + $0x8] sm:$0xff]  }
   0xb   :  { %313 = vmatpush1.bf16.msra.mxu1 %v714_v8 }
   0xc   :  { %633 = vmatpush3.bf16.msra.mxu0 %v715_v9  ;;  %314 = vmatprep.subr.bf16.mxu1 %v770_v1  ;;  %v110_v37 = vcombine.high %v108_v35, %v108_v35 }
   0xd   :  { %634 = vmatprep.subr.bf16.mxu0 %v716_v10  ;;  %300 = vmatprep.mubr.bf16.mxu0 %v108_v35 }
   0xe   :  { %609 = vmatprep.mubr.msk.bf16.mxu1 %vm264_vm0, %v110_v37 }
   0xf   :  { %315 = vmatpush1.bf16.msra.mxu1 %v717_v11 }
  0x10   :  { %635 = vmatpush3.bf16.msra.mxu0 %v718_v12  ;;  %316 = vmatprep.subr.bf16.mxu1 %v770_v1 }
  0x11   :  { %636 = vmatprep.subr.bf16.mxu0 %v719_v13 }
  0x13   :  { %317 = vmatpush1.bf16.msra.mxu1 %v720_v14 }
  0x14   :  { %637 = vmatpush3.bf16.msra.mxu0 %v721_v15  ;;  %318 = vmatprep.subr.bf16.mxu1 %v770_v1 }
  0x15   :  { %638 = vmatprep.subr.bf16.mxu0 %v722_v16 }
  0x17   :  { %319 = vmatpush1.bf16.msra.mxu1 %v723_v17 }
  0x18   :  { %639 = vmatpush3.bf16.msra.mxu0 %v724_v18  ;;  %320 = vmatprep.subr.bf16.mxu1 %v770_v1 }
  0x19   :  { %640 = vmatprep.subr.bf16.mxu0 %v725_v19 }
  0x1b   :  { %321 = vmatpush1.bf16.msra.mxu1 %v726_v21 }
  0x1c   :  { %641 = vmatpush3.bf16.msra.mxu0 %v727_v22  ;;  %322 = vmatprep.subr.bf16.mxu1 %v770_v1 }
  0x1d   :  { %642 = vmatprep.subr.bf16.mxu0 %v728_v24 }
  0x1f   :  { %323 = vmatpush1.bf16.msra.mxu1 %v729_v28 }
  0x20   :  { %643 = vmatpush3.bf16.msra.mxu0 %v730_v31  ;;  %324 = vmatprep.subr.bf16.mxu1 %v770_v1 }
  0x21   :  { %666 = vmatprep.subr.bf16.mxu0 %v772_v38 }
  0x23   :  { %301 = vmatmul.mubr.bf16.vlgmr.msra.gmra.mrb[0].mxu0 %v101_v36  ;;  %325 = vmatpush1.bf16.msra.mxu1 %v731_v33 }
  0x24   :  { %667 = vmatpush3.bf16.msra.mxu0 %v732_v34 }
  0x25   :  { %12 = vsyncpa [#allocation3], 0  ;;  %668 = vmatprep.subr.bf16.mxu0 %v772_v38  ;;  %686 = vmatprep.subr.bf16.mxu1 %v772_v38  ;;  %v734_v41 = vld [vmem:[%s984_s3 + $0x10] sm:$0xff]   ;;  %v735_v42 = vld [vmem:[%s984_s3 + $0x18] sm:$0xff]   ;;  %vm421_vm1 = vcmask 1043456   ;;  %vm773_vm2 = vmmov 0  }
  0x26   :  { %341 = vmatmul.mubr.bf16.vlgmr.msra.gmra.mrb[0].mxu1 %v109_v39  ;;  %v736_v43 = vld [vmem:[%s984_s3 + $0x20] sm:$0xff]   ;;  %v737_v44 = vld [vmem:[%s984_s3 + $0x28] sm:$0xff]   ;;  %v738_v45 = vld [vmem:[%s984_s3 + $0x30] sm:$0xff]   ;;  %682 = vmatprep.mubr.msk.bf16.mxu0 %vm773_vm2, %v772_v38  ;;  %vm417_vm3 = vcmask 982016   ;;  %vm522_vm4 = vcmask 1041408   ;;  %vm518_vm5 = vcmask 687104  }
  0x27   :  { %v739_v46 = vld [vmem:[%s984_s3 + $0x38] ss:$0 sps:$4 sm:$0xff]   ;;  %698 = vmatprep.mubr.msk.bf16.mxu1 %vm773_vm2, %v772_v38  ;;  %v740_v48 = vld [vmem:[%s986_s5] sm:$0xff]   ;;  %v741_v49 = vld [vmem:[%s986_s5 + $0x8] sm:$0xff]   ;;  %vm566_vm6 = vcmask 74752  }
  0x28   :  { %669 = vmatpush3.bf16.msra.mxu0 %v733_v40  ;;  %v423_v47 = vsel %vm421_vm1, %v739_v46, 0  ;;  %687 = vmatpush3.bf16.msra.mxu1 %v740_v48  ;;  %v742_v50 = vld [vmem:[%s986_s5 + $0x10] sm:$0xff]   ;;  %v743_v51 = vld [vmem:[%s986_s5 + $0x18] sm:$0xff]   ;;  %v582_v54 = vld [vmem:[%s983_s2] ss:$0 sm:$0xff] }
  0x29   :  { %670 = vmatprep.subr.bf16.mxu0 %v772_v38  ;;  %688 = vmatprep.subr.bf16.mxu1 %v772_v38  ;;  %v744_v2 = vld [vmem:[%s986_s5 + $0x20] sm:$0xff]   ;;  %v745_v3 = vld [vmem:[%s986_s5 + $0x28] ss:$0 sps:$4 sm:$0x33]   ;;  %s774_s5 = smov [#allocation2]  }
  0x2a   :  { %v524_v4 = vsel %vm522_vm4, %v745_v3, 0  ;;  %v610_v5 = vld [vmem:[%s985_s4] ss:$0 sm:$0xff]  ;;  %s574_s12 = sshll.u32 %s774_s5, 4  ;;  %s575_s12 = int_to_ptr.vmem [resolvable:$true] %s574_s12 }
  0x2b   :  { %v620_v13 = vld [vmem:[%s987_s6] ss:$0 sm:$0xff]  ;;  %s746_s4 = scalar_lea.vmem %s575_s12, 32  ;;  %p751_p1 = scmp.lt.s32.totalorder %s575_s12, %s575_s12 }
  0x2c   :  { %671 = vmatpush3.bf16.msra.mxu0 %v734_v41  ;;  %689 = vmatpush3.bf16.msra.mxu1 %v741_v49  ;;  %p747_p0 = scmp.ne.s32.totalorder %s575_s12, %s746_s4  ;;  %p752_p2 = scmp.lt.s32.totalorder %s746_s4, %s746_s4 }
  0x2d   :  { %672 = vmatprep.subr.bf16.mxu0 %v772_v38  ;;  %690 = vmatprep.subr.bf16.mxu1 %v772_v38 }
  0x2e   :  { %p753_p3 = por %p752_p2, %p751_p1 }
  0x30   :  { %673 = vmatpush3.bf16.msra.mxu0 %v735_v42  ;;  %691 = vmatpush3.bf16.msra.mxu1 %v742_v50  ;;  %p754_p4 = pnand %p753_p3, %p747_p0 }
  0x31   :  { %674 = vmatprep.subr.bf16.mxu0 %v772_v38  ;;  %692 = vmatprep.subr.bf16.mxu1 %v772_v38 }
  0x34   :  { %675 = vmatpush3.bf16.msra.mxu0 %v736_v43  ;;  %693 = vmatpush3.bf16.msra.mxu1 %v743_v51 }
  0x35   :  { %676 = vmatprep.subr.bf16.mxu0 %v772_v38  ;;  %694 = vmatprep.subr.bf16.mxu1 %v772_v38 }
  0x38   :  { %677 = vmatpush3.bf16.msra.mxu0 %v737_v44  ;;  %695 = vmatpush3.bf16.msra.mxu1 %v744_v2 }
  0x39   :  { %678 = vmatprep.subr.bf16.mxu0 %v772_v38  ;;  %696 = vmatprep.subr.bf16.mxu1 %v772_v38 }
  0x3c   :  { %679 = vmatpush3.bf16.msra.mxu0 %v738_v45  ;;  %697 = vmatpush3.bf16.msra.mxu1 %v524_v4 }
  0x3d   :  { %680 = vmatprep.subr.bf16.mxu0 %v772_v38 }
  0x40   :  { %681 = vmatpush3.bf16.msra.mxu0 %v423_v47 }
  0xf6   :  { %v644_v52 = vpop.f32.mrb[0].mxu0 }
  0xf7   :  { %v645_v53 = vpop.f32.mrb[1].mxu0 }
  0xf8   :  { %v646_v55 = vadd.f32 %v645_v53, %v644_v52  ;;  %v647_v56 = vpop.f32.mrb[2].mxu0 }
  0xf9   :  { %v648_v57 = vpop.f32.mrb[3].mxu0  ;;  %v342_v58 = vpop.f32.mrb[0].mxu1 }
  0xfa   :  { %v303_v59 = vadd.f32 %v646_v55, %v582_v54  ;;  %v344_v60 = vpop.f32.mrb[1].mxu1 }
  0xfb   :  { %v345_v61 = vpop.f32.mrb[2].mxu1 }
  0xfc   :  { %v343_v62 = vadd.f32 %v342_v58, %v303_v59  ;;  %v346_v63 = vpop.f32.mrb[3].mxu1 }
  0xfe   :  { %v348_v0 = vmax.f32 %v343_v62, 0.0 }
 0x100   :  { %v349_v1 = vpack.c.bf16 %v348_v0, %v348_v0 }
 0x102   :  { %683 = vmatmul.mubr.msk.bf16.vlgmr.msra.gmra.mrb[4].mxu0 %vm417_vm3, %v349_v1 }
 0x1d5   :  { %v459_v6 = vpop.f32.mrb[4].mxu0 }
 0x1d6   :  { %v460_v7 = vadd.f32 %v610_v5, %v459_v6  ;;  %v684_v8 = vpop.f32.mrb[5].mxu0 }
 0x1d7   :  { %v462_v9 = vpop.f32.mrb[6].mxu0 }
 0x1d8   :  { %v465_v10 = vmax.f32 %v460_v7, 0.0  ;;  %v685_v11 = vpop.f32.mrb[7].mxu0 }
 0x1da   :  { %v466_v12 = vpack.c.bf16 %v465_v10, %v465_v10 }
 0x1dc   :  { %699 = vmatmul.mubr.msk.bf16.vlgmr.msra.gmra.mrb[4].mxu1 %vm518_vm5, %v466_v12 }
 0x2af   :  { %v560_v14 = vpop.f32.mrb[4].mxu1 }
 0x2b0   :  { %v561_v15 = vadd.f32 %v620_v13, %v560_v14  ;;  %v700_v16 = vpop.f32.mrb[5].mxu1 }
 0x2b1   :  { %v563_v17 = vpop.f32.mrb[6].mxu1 }
 0x2b2   :  { %v701_v18 = vpop.f32.mrb[7].mxu1  ;;  %567 = vst.msk [vmem:[#allocation2] sm:$0x3] %vm566_vm6, %v561_v15 }
 0x2b3   :  { %757 = shalt.err (!%p754_p4)
}
 0x2b4   :  { %s758_s6 = scalar_lea.hbm %s988_s7, 32 }
 0x2b5   :  { %p759_p5 = scmp.ne.s32.totalorder %s988_s7, %s758_s6  ;;  %p762_p6 = scmp.lt.u32.totalorder %s758_s6, %s988_s7 }
 0x2b7   :  { %p764_p7 = pnand %p762_p6, %p759_p5 }
 0x2b9   :  { %767 = shalt.err (!%p764_p7)
}
 0x2ba   :  { %577 = dma.vmem_to_hbm [thread:$0]  %s575_s12, 32, %s988_s7, [#allocation3]  }
 0x2bb   :  { %768 = dma.done.wait [#allocation3], 32  }
 0x2bc   :  { %769 = vsyncadd [#allocation3], 4294967264 }
 0x2bd   :  { %581 = vsyncpa [#allocation3], 1 }

</bundles_post_ra>
